<compile_context>
chip_gen: v7x
topology: tpu7x:2x2x1
jax: 0.10.0
libtpu: 0.0.40
codegen_flags: <defaults>
</compile_context>

<pallas_src>
import math
import jax
import jax.numpy as jnp
from jax import lax
from jax.experimental import pallas as pl
from jax.experimental.pallas import tpu as pltpu

# ------------------------- scaled-down BERT config -------------------------
B, S = 2, 8            # batch, sequence length
BS = B * S             # batch*seq rows (sublane axis)
VOCAB = 100            # vocab size
H = 32                 # hidden size   (768 in real BERT)
NH = 2                 # attention heads
HD = H // NH           # head dim
FF = 4 * H             # FFN intermediate size
NUM_LAYERS = 2         # encoder layers
NUM_CLASSES = 2
CPAD = 128             # lane-padded logits width (stores lane-dense; sliced off outside)
EPS = 1e-12            # BERT LayerNorm eps


# ------------------------------ kernel helpers ------------------------------
def _ln(x, g, b):
    mu = jnp.mean(x, axis=-1, keepdims=True)
    var = jnp.mean((x - mu) ** 2, axis=-1, keepdims=True)
    return (x - mu) * lax.rsqrt(var + EPS) * g + b


def _gelu(x):
    # tanh approximation of GELU (HF BERT uses exact erf; tiny deviation).
    return 0.5 * x * (1.0 + jnp.tanh(0.7978845608028654 * (x + 0.044715 * x * x * x)))


# ------------------------------ fused Pallas kernel --------------------------
def bert_fused_kernel(emb_ref, addmask_ref, wamask_ref,
                      emb_g_ref, emb_b_ref,
                      wqkv_ref, bqkv_ref, wo_ref, bo_ref,
                      ln1_g_ref, ln1_b_ref,
                      w1_ref, b1_ref, w2_ref, b2_ref,
                      ln2_g_ref, ln2_b_ref,
                      wa_w_ref, wa_b_ref, wa_u_ref,
                      cls_w1_ref, cls_b1_ref, cls_w2_ref, cls_b2_ref,
                      o_ref):
    scale = 1.0 / math.sqrt(HD)
    add_mask = addmask_ref[...]                                # (B, 1, S) additive key mask

    # ---- embedding LayerNorm; flatten batch*seq onto the sublane axis ----
    x = _ln(emb_ref[...].reshape(BS, H), emb_g_ref[...], emb_b_ref[...])   # (BS, H)

    # ---- transformer encoder layers (stacked weights, layer loop in-kernel) ----
    def layer_body(l, x):
        # fused QKV projection: one (BS,H)x(H,3H) MXU pass instead of three.
        qkv = jnp.dot(x, wqkv_ref[l], preferred_element_type=jnp.float32) + bqkv_ref[l]
        wo = wo_ref[l]                                         # (H, H)
        attn = jnp.zeros((BS, H), jnp.float32)
        for h in range(NH):            # static NH=2; batch handled inside each einsum
            qh = qkv[:, h * HD:(h + 1) * HD].reshape(B, S, HD)
            kh = qkv[:, H + h * HD:H + (h + 1) * HD].reshape(B, S, HD)
            vh = qkv[:, 2 * H + h * HD:2 * H + (h + 1) * HD].reshape(B, S, HD)
            s = jnp.einsum('bqd,bkd->bqk', qh, kh,
                           preferred_element_type=jnp.float32) * scale + add_mask
            s = s - jnp.max(s, axis=-1, keepdims=True)
            p = jnp.exp(s)
            p = p * pl.reciprocal(jnp.sum(p, axis=-1, keepdims=True), approx=True)
            ctx = jnp.einsum('bqk,bkd->bqd', p, vh,
                             preferred_element_type=jnp.float32)          # (B, S, HD)
            # output projection distributed over heads -> no concatenate/relayout
            attn = attn + jnp.dot(ctx.reshape(BS, HD), wo[h * HD:(h + 1) * HD, :],
                                  preferred_element_type=jnp.float32)
        attn = attn + bo_ref[l]
        h1 = _ln(x + attn, ln1_g_ref[l], ln1_b_ref[l])

        ff = _gelu(jnp.dot(h1, w1_ref[l], preferred_element_type=jnp.float32) + b1_ref[l])
        ff = jnp.dot(ff, w2_ref[l], preferred_element_type=jnp.float32) + b2_ref[l]
        return _ln(h1 + ff, ln2_g_ref[l], ln2_b_ref[l])

    x = lax.fori_loop(0, NUM_LAYERS, layer_body, x, unroll=True)           # (BS, H)

    # ---- WordAttention pooling: sequence axis on lanes ----
    u_it = jnp.tanh(jnp.dot(x, wa_w_ref[...], preferred_element_type=jnp.float32)
                    + wa_b_ref[...])                                       # (BS, H)
    # per-token scores as a lane-wide row (1, BS): u . u_it
    t_row = jnp.einsum('qd,kd->qk', wa_u_ref[...], u_it,
                       preferred_element_type=jnp.float32)                 # (1, BS)
    keep = wamask_ref[...] > 0.5                                           # (B, BS) block-diag & valid
    sc = jnp.where(keep, t_row, -1e9)
    sc = sc - jnp.max(sc, axis=-1, keepdims=True)
    pw = jnp.exp(sc)
    pw = pw * pl.reciprocal(jnp.sum(pw, axis=-1, keepdims=True), approx=True)
    pooled = jnp.dot(pw, x, preferred_element_type=jnp.float32)            # (B, H)

    # ---- classifier head (dropout = identity at inference) ----
    # TODO(synk): training-mode dropout (stateful pltpu.prng_* masking) not implemented.
    hcls = jnp.maximum(
        jnp.dot(pooled, cls_w1_ref[...], preferred_element_type=jnp.float32)
        + cls_b1_ref[...], 0.0)
    o_ref[...] = (jnp.dot(hcls, cls_w2_ref[...], preferred_element_type=jnp.float32)
                  + cls_b2_ref[...])                                       # (B, CPAD)


# ------------------------------ parameter init -------------------------------
def xavier_uniform(key, shape):
    fan_in, fan_out = shape[0], shape[1]
    limit = math.sqrt(6.0 / (fan_in + fan_out))
    return jax.random.uniform(key, shape, jnp.float32, -limit, limit)


def init_params(key):
    keys = iter(jax.random.split(key, 64))
    p = {}
    p["word_emb"] = 0.02 * jax.random.normal(next(keys), (VOCAB, H), jnp.float32)
    p["pos_emb"] = 0.02 * jax.random.normal(next(keys), (S, H), jnp.float32)
    p["type_emb"] = 0.02 * jax.random.normal(next(keys), (2, H), jnp.float32)
    p["emb_ln_g"] = jnp.ones((1, H), jnp.float32)
    p["emb_ln_b"] = jnp.zeros((1, H), jnp.float32)

    wqkv, wo, w1, w2 = [], [], [], []
    for _ in range(NUM_LAYERS):
        wq = xavier_uniform(next(keys), (H, H))
        wk = xavier_uniform(next(keys), (H, H))
        wv = xavier_uniform(next(keys), (H, H))
        wqkv.append(jnp.concatenate([wq, wk, wv], axis=1))      # fused (H, 3H)
        wo.append(xavier_uniform(next(keys), (H, H)))
        w1.append(xavier_uniform(next(keys), (H, FF)))
        w2.append(xavier_uniform(next(keys), (FF, H)))
    p["wqkv"] = jnp.stack(wqkv)                                 # (L, H, 3H)
    p["bqkv"] = jnp.zeros((NUM_LAYERS, 1, 3 * H), jnp.float32)
    p["wo"] = jnp.stack(wo)                                     # (L, H, H)
    p["bo"] = jnp.zeros((NUM_LAYERS, 1, H), jnp.float32)
    p["ln1_g"] = jnp.ones((NUM_LAYERS, 1, H), jnp.float32)
    p["ln1_b"] = jnp.zeros((NUM_LAYERS, 1, H), jnp.float32)
    p["w1"] = jnp.stack(w1)                                     # (L, H, FF)
    p["b1"] = jnp.zeros((NUM_LAYERS, 1, FF), jnp.float32)
    p["w2"] = jnp.stack(w2)                                     # (L, FF, H)
    p["b2"] = jnp.zeros((NUM_LAYERS, 1, H), jnp.float32)
    p["ln2_g"] = jnp.ones((NUM_LAYERS, 1, H), jnp.float32)
    p["ln2_b"] = jnp.zeros((NUM_LAYERS, 1, H), jnp.float32)

    # WordAttention(H): context vector stored as a (1, H) row for lane-wide scores.
    p["wa_w"] = xavier_uniform(next(keys), (H, H))
    p["wa_b"] = jnp.zeros((1, H), jnp.float32)
    p["wa_u"] = xavier_uniform(next(keys), (H, 1)).T            # (1, H)

    # classifier: Linear(H, H//4) -> ReLU -> Linear(H//4, NUM_CLASSES)
    # last weight zero-padded to CPAD output lanes (lane-dense store).
    p["cls_w1"] = xavier_uniform(next(keys), (H, H // 4))
    p["cls_b1"] = jnp.zeros((1, H // 4), jnp.float32)
    w2c = xavier_uniform(next(keys), (H // 4, NUM_CLASSES))
    p["cls_w2"] = jnp.zeros((H // 4, CPAD), jnp.float32).at[:, :NUM_CLASSES].set(w2c)
    p["cls_b2"] = jnp.zeros((1, CPAD), jnp.float32)
    return p


# --------------------------------- forward -----------------------------------
def bert_classifier_forward(params, input_ids, attn_mask):
    # Glue outside the kernel: embedding gather (no clean Pallas equivalent at
    # this scale) and mask precomputation; everything else is one fused kernel.
    emb = (params["word_emb"][input_ids]                        # (B, S, H)
           + params["pos_emb"][None, :, :]
           + params["type_emb"][0][None, None, :]).astype(jnp.float32)

    mask_f = attn_mask.astype(jnp.float32)                      # (B, S)
    add_mask = ((1.0 - mask_f) * -1e9)[:, None, :]              # (B, 1, S) additive key mask
    # block-diagonal word-attention mask: token j belongs to batch j//S and is valid
    blockdiag = jnp.repeat(jnp.eye(B, dtype=jnp.float32), S, axis=1)   # (B, BS)
    wa_mask = blockdiag * mask_f.reshape(1, BS)                         # (B, BS)

    args = (emb, add_mask, wa_mask,
            params["emb_ln_g"], params["emb_ln_b"],
            params["wqkv"], params["bqkv"], params["wo"], params["bo"],
            params["ln1_g"], params["ln1_b"],
            params["w1"], params["b1"], params["w2"], params["b2"],
            params["ln2_g"], params["ln2_b"],
            params["wa_w"], params["wa_b"], params["wa_u"],
            params["cls_w1"], params["cls_b1"], params["cls_w2"], params["cls_b2"])

    logits_pad = pl.pallas_call(
        bert_fused_kernel,
        out_shape=jax.ShapeDtypeStruct((B, CPAD), jnp.float32),
        in_specs=[pl.BlockSpec(memory_space=pltpu.MemorySpace.VMEM)] * len(args),
        out_specs=pl.BlockSpec(memory_space=pltpu.MemorySpace.VMEM),
    )(*args)
    # strip the lane padding added for a dense vector store
    return logits_pad[:, :NUM_CLASSES]


# ----------------------------------- main ------------------------------------
if __name__ == "__main__":
    key = jax.random.PRNGKey(0)
    k_param, k_ids = jax.random.split(key)

    params = init_params(k_param)

    input_ids = jax.random.randint(k_ids, (B, S), 0, VOCAB, dtype=jnp.int32)
    # simple padding mask: first sequence full length, second padded to 5 tokens
    lengths = jnp.array([S, 5], dtype=jnp.int32)
    attn_mask = (jnp.arange(S)[None, :] < lengths[:, None]).astype(jnp.int32)

    logits = jax.jit(bert_classifier_forward)(params, input_ids, attn_mask)
    logits = jax.block_until_ready(logits)

    assert logits.shape == (B, NUM_CLASSES)
    assert bool(jnp.all(jnp.isfinite(logits)))
    print("KERNEL_OK")
</pallas_src>

<mosaic_0001>
module attributes {stable_mosaic.version = 11 : i64} {
  func.func @bert_fused_kernel(%arg0: memref<2x8x32xf32, #tpu.memory_space<vmem>>, %arg1: memref<2x1x8xf32, #tpu.memory_space<vmem>>, %arg2: memref<2x16xf32, #tpu.memory_space<vmem>>, %arg3: memref<1x32xf32, #tpu.memory_space<vmem>>, %arg4: memref<1x32xf32, #tpu.memory_space<vmem>>, %arg5: memref<2x32x96xf32, #tpu.memory_space<vmem>>, %arg6: memref<2x1x96xf32, #tpu.memory_space<vmem>>, %arg7: memref<2x32x32xf32, #tpu.memory_space<vmem>>, %arg8: memref<2x1x32xf32, #tpu.memory_space<vmem>>, %arg9: memref<2x1x32xf32, #tpu.memory_space<vmem>>, %arg10: memref<2x1x32xf32, #tpu.memory_space<vmem>>, %arg11: memref<2x32x128xf32, #tpu.memory_space<vmem>>, %arg12: memref<2x1x128xf32, #tpu.memory_space<vmem>>, %arg13: memref<2x128x32xf32, #tpu.memory_space<vmem>>, %arg14: memref<2x1x32xf32, #tpu.memory_space<vmem>>, %arg15: memref<2x1x32xf32, #tpu.memory_space<vmem>>, %arg16: memref<2x1x32xf32, #tpu.memory_space<vmem>>, %arg17: memref<32x32xf32, #tpu.memory_space<vmem>>, %arg18: memref<1x32xf32, #tpu.memory_space<vmem>>, %arg19: memref<1x32xf32, #tpu.memory_space<vmem>>, %arg20: memref<32x8xf32, #tpu.memory_space<vmem>>, %arg21: memref<1x8xf32, #tpu.memory_space<vmem>>, %arg22: memref<8x128xf32, #tpu.memory_space<vmem>>, %arg23: memref<1x128xf32, #tpu.memory_space<vmem>>, %arg24: memref<2x128xf32, #tpu.memory_space<vmem>>) attributes {dimension_semantics = [], scalar_prefetch = 0 : i64, scratch_operands = 0 : i64, tpu.core_type = #tpu.core_type<tc>} {
    %c0 = arith.constant 0 : index
    %c0_0 = arith.constant 0 : index
    %c0_1 = arith.constant 0 : index
    %0 = vector.load %arg1[%c0, %c0_0, %c0_1] : memref<2x1x8xf32, #tpu.memory_space<vmem>>, vector<2x1x8xf32>
    %c0_2 = arith.constant 0 : index
    %c0_3 = arith.constant 0 : index
    %c0_4 = arith.constant 0 : index
    %1 = vector.load %arg0[%c0_2, %c0_3, %c0_4] : memref<2x8x32xf32, #tpu.memory_space<vmem>>, vector<2x8x32xf32>
    %2 = vector.shape_cast %1 : vector<2x8x32xf32> to vector<16x32xf32>
    %c0_5 = arith.constant 0 : index
    %c0_6 = arith.constant 0 : index
    %3 = vector.load %arg3[%c0_5, %c0_6] : memref<1x32xf32, #tpu.memory_space<vmem>>, vector<1x32xf32>
    %c0_7 = arith.constant 0 : index
    %c0_8 = arith.constant 0 : index
    %4 = vector.load %arg4[%c0_7, %c0_8] : memref<1x32xf32, #tpu.memory_space<vmem>>, vector<1x32xf32>
    %cst = arith.constant dense<0.000000e+00> : vector<16xf32>
    %5 = vector.multi_reduction <add>, %2, %cst [1] : vector<16x32xf32> to vector<16xf32>
    %6 = vector.shape_cast %5 : vector<16xf32> to vector<16x1xf32>
    %cst_9 = arith.constant 3.200000e+01 : f32
    %7 = vector.broadcast %cst_9 : f32 to vector<16x1xf32>
    %8 = arith.divf %6, %7 : vector<16x1xf32>
    %9 = vector.broadcast %8 : vector<16x1xf32> to vector<16x32xf32>
    %10 = arith.subf %2, %9 : vector<16x32xf32>
    %11 = arith.mulf %10, %10 : vector<16x32xf32>
    %cst_10 = arith.constant dense<0.000000e+00> : vector<16xf32>
    %12 = vector.multi_reduction <add>, %11, %cst_10 [1] : vector<16x32xf32> to vector<16xf32>
    %13 = vector.shape_cast %12 : vector<16xf32> to vector<16x1xf32>
    %cst_11 = arith.constant 3.200000e+01 : f32
    %14 = vector.broadcast %cst_11 : f32 to vector<16x1xf32>
    %15 = arith.divf %13, %14 : vector<16x1xf32>
    %16 = vector.broadcast %8 : vector<16x1xf32> to vector<16x32xf32>
    %17 = arith.subf %2, %16 : vector<16x32xf32>
    %cst_12 = arith.constant 9.99999996E-13 : f32
    %18 = vector.broadcast %cst_12 : f32 to vector<16x1xf32>
    %19 = arith.addf %15, %18 : vector<16x1xf32>
    %20 = math.rsqrt %19 : vector<16x1xf32>
    %21 = vector.broadcast %20 : vector<16x1xf32> to vector<16x32xf32>
    %22 = arith.mulf %17, %21 : vector<16x32xf32>
    %23 = vector.broadcast %3 : vector<1x32xf32> to vector<16x32xf32>
    %24 = arith.mulf %22, %23 : vector<16x32xf32>
    %25 = vector.broadcast %4 : vector<1x32xf32> to vector<16x32xf32>
    %26 = arith.addf %24, %25 : vector<16x32xf32>
    %c0_i32 = arith.constant 0 : i32
    %27 = arith.index_cast %c0_i32 : i32 to index
    %c0_13 = arith.constant 0 : index
    %c0_14 = arith.constant 0 : index
    %28 = vector.load %arg5[%27, %c0_13, %c0_14] : memref<2x32x96xf32, #tpu.memory_space<vmem>>, vector<1x32x96xf32>
    %29 = vector.shape_cast %28 : vector<1x32x96xf32> to vector<32x96xf32>
    %cst_15 = arith.constant dense<0.000000e+00> : vector<16x96xf32>
    %30 = tpu.matmul %26, %29, %cst_15 {dimension_numbers = #tpu.dot_dimension_numbers<[1], [0], [0], [1], [0, 0, 1, 1], [], []>} : vector<16x32xf32>, vector<32x96xf32>, vector<16x96xf32> -> vector<16x96xf32>
    %31 = arith.index_cast %c0_i32 : i32 to index
    %c0_16 = arith.constant 0 : index
    %c0_17 = arith.constant 0 : index
    %32 = vector.load %arg6[%31, %c0_16, %c0_17] : memref<2x1x96xf32, #tpu.memory_space<vmem>>, vector<1x1x96xf32>
    %33 = vector.shape_cast %32 : vector<1x1x96xf32> to vector<1x96xf32>
    %34 = vector.broadcast %33 : vector<1x96xf32> to vector<16x96xf32>
    %35 = arith.addf %30, %34 : vector<16x96xf32>
    %36 = arith.index_cast %c0_i32 : i32 to index
    %c0_18 = arith.constant 0 : index
    %c0_19 = arith.constant 0 : index
    %37 = vector.load %arg7[%36, %c0_18, %c0_19] : memref<2x32x32xf32, #tpu.memory_space<vmem>>, vector<1x32x32xf32>
    %38 = vector.shape_cast %37 : vector<1x32x32xf32> to vector<32x32xf32>
    %cst_20 = arith.constant 0.000000e+00 : f32
    %39 = vector.broadcast %cst_20 : f32 to vector<16x32xf32>
    %40 = vector.extract_strided_slice %35 {offsets = [0, 0], sizes = [16, 16], strides = [1, 1]} : vector<16x96xf32> to vector<16x16xf32>
    %41 = vector.shape_cast %40 : vector<16x16xf32> to vector<2x8x16xf32>
    %42 = vector.extract_strided_slice %35 {offsets = [0, 32], sizes = [16, 16], strides = [1, 1]} : vector<16x96xf32> to vector<16x16xf32>
    %43 = vector.shape_cast %42 : vector<16x16xf32> to vector<2x8x16xf32>
    %44 = vector.extract_strided_slice %35 {offsets = [0, 64], sizes = [16, 16], strides = [1, 1]} : vector<16x96xf32> to vector<16x16xf32>
    %45 = vector.shape_cast %44 : vector<16x16xf32> to vector<2x8x16xf32>
    "tpu.trace_start"() <{level = 10 : i32, message = "bqd,bkd->bqk"}> : () -> ()
    %cst_21 = arith.constant dense<0.000000e+00> : vector<2x8x8xf32>
    %46 = tpu.matmul %41, %43, %cst_21 {dimension_numbers = #tpu.dot_dimension_numbers<[2], [2], [1], [1], [0, 0, 0, 1, 1, 1], [0], [0]>} : vector<2x8x16xf32>, vector<2x8x16xf32>, vector<2x8x8xf32> -> vector<2x8x8xf32>
    "tpu.trace_stop"() : () -> ()
    %cst_22 = arith.constant 2.500000e-01 : f32
    %47 = vector.broadcast %cst_22 : f32 to vector<2x8x8xf32>
    %48 = arith.mulf %46, %47 : vector<2x8x8xf32>
    %49 = vector.broadcast %0 : vector<2x1x8xf32> to vector<2x8x8xf32>
    %50 = arith.addf %48, %49 : vector<2x8x8xf32>
    %cst_23 = arith.constant dense<0xFF800000> : vector<2x8xf32>
    %51 = vector.multi_reduction <maximumf>, %50, %cst_23 [2] : vector<2x8x8xf32> to vector<2x8xf32>
    %52 = vector.shape_cast %51 : vector<2x8xf32> to vector<2x8x1xf32>
    %53 = vector.broadcast %52 : vector<2x8x1xf32> to vector<2x8x8xf32>
    %54 = arith.subf %50, %53 : vector<2x8x8xf32>
    %55 = math.exp %54 : vector<2x8x8xf32>
    %cst_24 = arith.constant dense<0.000000e+00> : vector<2x8xf32>
    %56 = vector.multi_reduction <add>, %55, %cst_24 [2] : vector<2x8x8xf32> to vector<2x8xf32>
    %57 = vector.shape_cast %56 : vector<2x8xf32> to vector<2x8x1xf32>
    %58 = tpu.reciprocal %57 {approx = true} : vector<2x8x1xf32> -> vector<2x8x1xf32>
    %59 = vector.broadcast %58 : vector<2x8x1xf32> to vector<2x8x8xf32>
    %60 = arith.mulf %55, %59 : vector<2x8x8xf32>
    "tpu.trace_start"() <{level = 10 : i32, message = "bqk,bkd->bqd"}> : () -> ()
    %cst_25 = arith.constant dense<0.000000e+00> : vector<2x8x16xf32>
    %61 = tpu.matmul %60, %45, %cst_25 {dimension_numbers = #tpu.dot_dimension_numbers<[2], [1], [1], [2], [0, 0, 0, 1, 1, 2], [0], [0]>} : vector<2x8x8xf32>, vector<2x8x16xf32>, vector<2x8x16xf32> -> vector<2x8x16xf32>
    "tpu.trace_stop"() : () -> ()
    %62 = vector.shape_cast %61 : vector<2x8x16xf32> to vector<16x16xf32>
    %63 = vector.extract_strided_slice %38 {offsets = [0, 0], sizes = [16, 32], strides = [1, 1]} : vector<32x32xf32> to vector<16x32xf32>
    %cst_26 = arith.constant dense<0.000000e+00> : vector<16x32xf32>
    %64 = tpu.matmul %62, %63, %cst_26 {dimension_numbers = #tpu.dot_dimension_numbers<[1], [0], [0], [1], [0, 0, 1, 1], [], []>} : vector<16x16xf32>, vector<16x32xf32>, vector<16x32xf32> -> vector<16x32xf32>
    %65 = arith.addf %39, %64 : vector<16x32xf32>
    %66 = vector.extract_strided_slice %35 {offsets = [0, 16], sizes = [16, 16], strides = [1, 1]} : vector<16x96xf32> to vector<16x16xf32>
    %67 = vector.shape_cast %66 : vector<16x16xf32> to vector<2x8x16xf32>
    %68 = vector.extract_strided_slice %35 {offsets = [0, 48], sizes = [16, 16], strides = [1, 1]} : vector<16x96xf32> to vector<16x16xf32>
    %69 = vector.shape_cast %68 : vector<16x16xf32> to vector<2x8x16xf32>
    %70 = vector.extract_strided_slice %35 {offsets = [0, 80], sizes = [16, 16], strides = [1, 1]} : vector<16x96xf32> to vector<16x16xf32>
    %71 = vector.shape_cast %70 : vector<16x16xf32> to vector<2x8x16xf32>
    "tpu.trace_start"() <{level = 10 : i32, message = "bqd,bkd->bqk"}> : () -> ()
    %cst_27 = arith.constant dense<0.000000e+00> : vector<2x8x8xf32>
    %72 = tpu.matmul %67, %69, %cst_27 {dimension_numbers = #tpu.dot_dimension_numbers<[2], [2], [1], [1], [0, 0, 0, 1, 1, 1], [0], [0]>} : vector<2x8x16xf32>, vector<2x8x16xf32>, vector<2x8x8xf32> -> vector<2x8x8xf32>
    "tpu.trace_stop"() : () -> ()
    %cst_28 = arith.constant 2.500000e-01 : f32
    %73 = vector.broadcast %cst_28 : f32 to vector<2x8x8xf32>
    %74 = arith.mulf %72, %73 : vector<2x8x8xf32>
    %75 = vector.broadcast %0 : vector<2x1x8xf32> to vector<2x8x8xf32>
    %76 = arith.addf %74, %75 : vector<2x8x8xf32>
    %cst_29 = arith.constant dense<0xFF800000> : vector<2x8xf32>
    %77 = vector.multi_reduction <maximumf>, %76, %cst_29 [2] : vector<2x8x8xf32> to vector<2x8xf32>
    %78 = vector.shape_cast %77 : vector<2x8xf32> to vector<2x8x1xf32>
    %79 = vector.broadcast %78 : vector<2x8x1xf32> to vector<2x8x8xf32>
    %80 = arith.subf %76, %79 : vector<2x8x8xf32>
    %81 = math.exp %80 : vector<2x8x8xf32>
    %cst_30 = arith.constant dense<0.000000e+00> : vector<2x8xf32>
    %82 = vector.multi_reduction <add>, %81, %cst_30 [2] : vector<2x8x8xf32> to vector<2x8xf32>
    %83 = vector.shape_cast %82 : vector<2x8xf32> to vector<2x8x1xf32>
    %84 = tpu.reciprocal %83 {approx = true} : vector<2x8x1xf32> -> vector<2x8x1xf32>
    %85 = vector.broadcast %84 : vector<2x8x1xf32> to vector<2x8x8xf32>
    %86 = arith.mulf %81, %85 : vector<2x8x8xf32>
    "tpu.trace_start"() <{level = 10 : i32, message = "bqk,bkd->bqd"}> : () -> ()
    %cst_31 = arith.constant dense<0.000000e+00> : vector<2x8x16xf32>
    %87 = tpu.matmul %86, %71, %cst_31 {dimension_numbers = #tpu.dot_dimension_numbers<[2], [1], [1], [2], [0, 0, 0, 1, 1, 2], [0], [0]>} : vector<2x8x8xf32>, vector<2x8x16xf32>, vector<2x8x16xf32> -> vector<2x8x16xf32>
    "tpu.trace_stop"() : () -> ()
    %88 = vector.shape_cast %87 : vector<2x8x16xf32> to vector<16x16xf32>
    %89 = vector.extract_strided_slice %38 {offsets = [16, 0], sizes = [16, 32], strides = [1, 1]} : vector<32x32xf32> to vector<16x32xf32>
    %cst_32 = arith.constant dense<0.000000e+00> : vector<16x32xf32>
    %90 = tpu.matmul %88, %89, %cst_32 {dimension_numbers = #tpu.dot_dimension_numbers<[1], [0], [0], [1], [0, 0, 1, 1], [], []>} : vector<16x16xf32>, vector<16x32xf32>, vector<16x32xf32> -> vector<16x32xf32>
    %91 = arith.addf %65, %90 : vector<16x32xf32>
    %92 = arith.index_cast %c0_i32 : i32 to index
    %c0_33 = arith.constant 0 : index
    %c0_34 = arith.constant 0 : index
    %93 = vector.load %arg8[%92, %c0_33, %c0_34] : memref<2x1x32xf32, #tpu.memory_space<vmem>>, vector<1x1x32xf32>
    %94 = vector.shape_cast %93 : vector<1x1x32xf32> to vector<1x32xf32>
    %95 = vector.broadcast %94 : vector<1x32xf32> to vector<16x32xf32>
    %96 = arith.addf %91, %95 : vector<16x32xf32>
    %97 = arith.addf %26, %96 : vector<16x32xf32>
    %98 = arith.index_cast %c0_i32 : i32 to index
    %c0_35 = arith.constant 0 : index
    %c0_36 = arith.constant 0 : index
    %99 = vector.load %arg9[%98, %c0_35, %c0_36] : memref<2x1x32xf32, #tpu.memory_space<vmem>>, vector<1x1x32xf32>
    %100 = vector.shape_cast %99 : vector<1x1x32xf32> to vector<1x32xf32>
    %101 = arith.index_cast %c0_i32 : i32 to index
    %c0_37 = arith.constant 0 : index
    %c0_38 = arith.constant 0 : index
    %102 = vector.load %arg10[%101, %c0_37, %c0_38] : memref<2x1x32xf32, #tpu.memory_space<vmem>>, vector<1x1x32xf32>
    %103 = vector.shape_cast %102 : vector<1x1x32xf32> to vector<1x32xf32>
    %cst_39 = arith.constant dense<0.000000e+00> : vector<16xf32>
    %104 = vector.multi_reduction <add>, %97, %cst_39 [1] : vector<16x32xf32> to vector<16xf32>
    %105 = vector.shape_cast %104 : vector<16xf32> to vector<16x1xf32>
    %cst_40 = arith.constant 3.200000e+01 : f32
    %106 = vector.broadcast %cst_40 : f32 to vector<16x1xf32>
    %107 = arith.divf %105, %106 : vector<16x1xf32>
    %108 = vector.broadcast %107 : vector<16x1xf32> to vector<16x32xf32>
    %109 = arith.subf %97, %108 : vector<16x32xf32>
    %110 = arith.mulf %109, %109 : vector<16x32xf32>
    %cst_41 = arith.constant dense<0.000000e+00> : vector<16xf32>
    %111 = vector.multi_reduction <add>, %110, %cst_41 [1] : vector<16x32xf32> to vector<16xf32>
    %112 = vector.shape_cast %111 : vector<16xf32> to vector<16x1xf32>
    %cst_42 = arith.constant 3.200000e+01 : f32
    %113 = vector.broadcast %cst_42 : f32 to vector<16x1xf32>
    %114 = arith.divf %112, %113 : vector<16x1xf32>
    %115 = vector.broadcast %107 : vector<16x1xf32> to vector<16x32xf32>
    %116 = arith.subf %97, %115 : vector<16x32xf32>
    %cst_43 = arith.constant 9.99999996E-13 : f32
    %117 = vector.broadcast %cst_43 : f32 to vector<16x1xf32>
    %118 = arith.addf %114, %117 : vector<16x1xf32>
    %119 = math.rsqrt %118 : vector<16x1xf32>
    %120 = vector.broadcast %119 : vector<16x1xf32> to vector<16x32xf32>
    %121 = arith.mulf %116, %120 : vector<16x32xf32>
    %122 = vector.broadcast %100 : vector<1x32xf32> to vector<16x32xf32>
    %123 = arith.mulf %121, %122 : vector<16x32xf32>
    %124 = vector.broadcast %103 : vector<1x32xf32> to vector<16x32xf32>
    %125 = arith.addf %123, %124 : vector<16x32xf32>
    %126 = arith.index_cast %c0_i32 : i32 to index
    %c0_44 = arith.constant 0 : index
    %c0_45 = arith.constant 0 : index
    %127 = vector.load %arg11[%126, %c0_44, %c0_45] : memref<2x32x128xf32, #tpu.memory_space<vmem>>, vector<1x32x128xf32>
    %128 = vector.shape_cast %127 : vector<1x32x128xf32> to vector<32x128xf32>
    %cst_46 = arith.constant dense<0.000000e+00> : vector<16x128xf32>
    %129 = tpu.matmul %125, %128, %cst_46 {dimension_numbers = #tpu.dot_dimension_numbers<[1], [0], [0], [1], [0, 0, 1, 1], [], []>} : vector<16x32xf32>, vector<32x128xf32>, vector<16x128xf32> -> vector<16x128xf32>
    %130 = arith.index_cast %c0_i32 : i32 to index
    %c0_47 = arith.constant 0 : index
    %c0_48 = arith.constant 0 : index
    %131 = vector.load %arg12[%130, %c0_47, %c0_48] : memref<2x1x128xf32, #tpu.memory_space<vmem>>, vector<1x1x128xf32>
    %132 = vector.shape_cast %131 : vector<1x1x128xf32> to vector<1x128xf32>
    %133 = vector.broadcast %132 : vector<1x128xf32> to vector<16x128xf32>
    %134 = arith.addf %129, %133 : vector<16x128xf32>
    %cst_49 = arith.constant 5.000000e-01 : f32
    %135 = vector.broadcast %cst_49 : f32 to vector<16x128xf32>
    %136 = arith.mulf %135, %134 : vector<16x128xf32>
    %cst_50 = arith.constant 4.471500e-02 : f32
    %137 = vector.broadcast %cst_50 : f32 to vector<16x128xf32>
    %138 = arith.mulf %137, %134 : vector<16x128xf32>
    %139 = arith.mulf %138, %134 : vector<16x128xf32>
    %140 = arith.mulf %139, %134 : vector<16x128xf32>
    %141 = arith.addf %134, %140 : vector<16x128xf32>
    %cst_51 = arith.constant 0.797884583 : f32
    %142 = vector.broadcast %cst_51 : f32 to vector<16x128xf32>
    %143 = arith.mulf %142, %141 : vector<16x128xf32>
    %144 = math.tanh %143 : vector<16x128xf32>
    %cst_52 = arith.constant 1.000000e+00 : f32
    %145 = vector.broadcast %cst_52 : f32 to vector<16x128xf32>
    %146 = arith.addf %145, %144 : vector<16x128xf32>
    %147 = arith.mulf %136, %146 : vector<16x128xf32>
    %148 = arith.index_cast %c0_i32 : i32 to index
    %c0_53 = arith.constant 0 : index
    %c0_54 = arith.constant 0 : index
    %149 = vector.load %arg13[%148, %c0_53, %c0_54] : memref<2x128x32xf32, #tpu.memory_space<vmem>>, vector<1x128x32xf32>
    %150 = vector.shape_cast %149 : vector<1x128x32xf32> to vector<128x32xf32>
    %cst_55 = arith.constant dense<0.000000e+00> : vector<16x32xf32>
    %151 = tpu.matmul %147, %150, %cst_55 {dimension_numbers = #tpu.dot_dimension_numbers<[1], [0], [0], [1], [0, 0, 1, 1], [], []>} : vector<16x128xf32>, vector<128x32xf32>, vector<16x32xf32> -> vector<16x32xf32>
    %152 = arith.index_cast %c0_i32 : i32 to index
    %c0_56 = arith.constant 0 : index
    %c0_57 = arith.constant 0 : index
    %153 = vector.load %arg14[%152, %c0_56, %c0_57] : memref<2x1x32xf32, #tpu.memory_space<vmem>>, vector<1x1x32xf32>
    %154 = vector.shape_cast %153 : vector<1x1x32xf32> to vector<1x32xf32>
    %155 = vector.broadcast %154 : vector<1x32xf32> to vector<16x32xf32>
    %156 = arith.addf %151, %155 : vector<16x32xf32>
    %157 = arith.addf %125, %156 : vector<16x32xf32>
    %158 = arith.index_cast %c0_i32 : i32 to index
    %c0_58 = arith.constant 0 : index
    %c0_59 = arith.constant 0 : index
    %159 = vector.load %arg15[%158, %c0_58, %c0_59] : memref<2x1x32xf32, #tpu.memory_space<vmem>>, vector<1x1x32xf32>
    %160 = vector.shape_cast %159 : vector<1x1x32xf32> to vector<1x32xf32>
    %161 = arith.index_cast %c0_i32 : i32 to index
    %c0_60 = arith.constant 0 : index
    %c0_61 = arith.constant 0 : index
    %162 = vector.load %arg16[%161, %c0_60, %c0_61] : memref<2x1x32xf32, #tpu.memory_space<vmem>>, vector<1x1x32xf32>
    %163 = vector.shape_cast %162 : vector<1x1x32xf32> to vector<1x32xf32>
    %cst_62 = arith.constant dense<0.000000e+00> : vector<16xf32>
    %164 = vector.multi_reduction <add>, %157, %cst_62 [1] : vector<16x32xf32> to vector<16xf32>
    %165 = vector.shape_cast %164 : vector<16xf32> to vector<16x1xf32>
    %cst_63 = arith.constant 3.200000e+01 : f32
    %166 = vector.broadcast %cst_63 : f32 to vector<16x1xf32>
    %167 = arith.divf %165, %166 : vector<16x1xf32>
    %168 = vector.broadcast %167 : vector<16x1xf32> to vector<16x32xf32>
    %169 = arith.subf %157, %168 : vector<16x32xf32>
    %170 = arith.mulf %169, %169 : vector<16x32xf32>
    %cst_64 = arith.constant dense<0.000000e+00> : vector<16xf32>
    %171 = vector.multi_reduction <add>, %170, %cst_64 [1] : vector<16x32xf32> to vector<16xf32>
    %172 = vector.shape_cast %171 : vector<16xf32> to vector<16x1xf32>
    %cst_65 = arith.constant 3.200000e+01 : f32
    %173 = vector.broadcast %cst_65 : f32 to vector<16x1xf32>
    %174 = arith.divf %172, %173 : vector<16x1xf32>
    %175 = vector.broadcast %167 : vector<16x1xf32> to vector<16x32xf32>
    %176 = arith.subf %157, %175 : vector<16x32xf32>
    %cst_66 = arith.constant 9.99999996E-13 : f32
    %177 = vector.broadcast %cst_66 : f32 to vector<16x1xf32>
    %178 = arith.addf %174, %177 : vector<16x1xf32>
    %179 = math.rsqrt %178 : vector<16x1xf32>
    %180 = vector.broadcast %179 : vector<16x1xf32> to vector<16x32xf32>
    %181 = arith.mulf %176, %180 : vector<16x32xf32>
    %182 = vector.broadcast %160 : vector<1x32xf32> to vector<16x32xf32>
    %183 = arith.mulf %181, %182 : vector<16x32xf32>
    %184 = vector.broadcast %163 : vector<1x32xf32> to vector<16x32xf32>
    %185 = arith.addf %183, %184 : vector<16x32xf32>
    %c1_i32 = arith.constant 1 : i32
    %186 = arith.index_cast %c1_i32 : i32 to index
    %c0_67 = arith.constant 0 : index
    %c0_68 = arith.constant 0 : index
    %187 = vector.load %arg5[%186, %c0_67, %c0_68] : memref<2x32x96xf32, #tpu.memory_space<vmem>>, vector<1x32x96xf32>
    %188 = vector.shape_cast %187 : vector<1x32x96xf32> to vector<32x96xf32>
    %cst_69 = arith.constant dense<0.000000e+00> : vector<16x96xf32>
    %189 = tpu.matmul %185, %188, %cst_69 {dimension_numbers = #tpu.dot_dimension_numbers<[1], [0], [0], [1], [0, 0, 1, 1], [], []>} : vector<16x32xf32>, vector<32x96xf32>, vector<16x96xf32> -> vector<16x96xf32>
    %190 = arith.index_cast %c1_i32 : i32 to index
    %c0_70 = arith.constant 0 : index
    %c0_71 = arith.constant 0 : index
    %191 = vector.load %arg6[%190, %c0_70, %c0_71] : memref<2x1x96xf32, #tpu.memory_space<vmem>>, vector<1x1x96xf32>
    %192 = vector.shape_cast %191 : vector<1x1x96xf32> to vector<1x96xf32>
    %193 = vector.broadcast %192 : vector<1x96xf32> to vector<16x96xf32>
    %194 = arith.addf %189, %193 : vector<16x96xf32>
    %195 = arith.index_cast %c1_i32 : i32 to index
    %c0_72 = arith.constant 0 : index
    %c0_73 = arith.constant 0 : index
    %196 = vector.load %arg7[%195, %c0_72, %c0_73] : memref<2x32x32xf32, #tpu.memory_space<vmem>>, vector<1x32x32xf32>
    %197 = vector.shape_cast %196 : vector<1x32x32xf32> to vector<32x32xf32>
    %cst_74 = arith.constant 0.000000e+00 : f32
    %198 = vector.broadcast %cst_74 : f32 to vector<16x32xf32>
    %199 = vector.extract_strided_slice %194 {offsets = [0, 0], sizes = [16, 16], strides = [1, 1]} : vector<16x96xf32> to vector<16x16xf32>
    %200 = vector.shape_cast %199 : vector<16x16xf32> to vector<2x8x16xf32>
    %201 = vector.extract_strided_slice %194 {offsets = [0, 32], sizes = [16, 16], strides = [1, 1]} : vector<16x96xf32> to vector<16x16xf32>
    %202 = vector.shape_cast %201 : vector<16x16xf32> to vector<2x8x16xf32>
    %203 = vector.extract_strided_slice %194 {offsets = [0, 64], sizes = [16, 16], strides = [1, 1]} : vector<16x96xf32> to vector<16x16xf32>
    %204 = vector.shape_cast %203 : vector<16x16xf32> to vector<2x8x16xf32>
    "tpu.trace_start"() <{level = 10 : i32, message = "bqd,bkd->bqk"}> : () -> ()
    %cst_75 = arith.constant dense<0.000000e+00> : vector<2x8x8xf32>
    %205 = tpu.matmul %200, %202, %cst_75 {dimension_numbers = #tpu.dot_dimension_numbers<[2], [2], [1], [1], [0, 0, 0, 1, 1, 1], [0], [0]>} : vector<2x8x16xf32>, vector<2x8x16xf32>, vector<2x8x8xf32> -> vector<2x8x8xf32>
    "tpu.trace_stop"() : () -> ()
    %cst_76 = arith.constant 2.500000e-01 : f32
    %206 = vector.broadcast %cst_76 : f32 to vector<2x8x8xf32>
    %207 = arith.mulf %205, %206 : vector<2x8x8xf32>
    %208 = vector.broadcast %0 : vector<2x1x8xf32> to vector<2x8x8xf32>
    %209 = arith.addf %207, %208 : vector<2x8x8xf32>
    %cst_77 = arith.constant dense<0xFF800000> : vector<2x8xf32>
    %210 = vector.multi_reduction <maximumf>, %209, %cst_77 [2] : vector<2x8x8xf32> to vector<2x8xf32>
    %211 = vector.shape_cast %210 : vector<2x8xf32> to vector<2x8x1xf32>
    %212 = vector.broadcast %211 : vector<2x8x1xf32> to vector<2x8x8xf32>
    %213 = arith.subf %209, %212 : vector<2x8x8xf32>
    %214 = math.exp %213 : vector<2x8x8xf32>
    %cst_78 = arith.constant dense<0.000000e+00> : vector<2x8xf32>
    %215 = vector.multi_reduction <add>, %214, %cst_78 [2] : vector<2x8x8xf32> to vector<2x8xf32>
    %216 = vector.shape_cast %215 : vector<2x8xf32> to vector<2x8x1xf32>
    %217 = tpu.reciprocal %216 {approx = true} : vector<2x8x1xf32> -> vector<2x8x1xf32>
    %218 = vector.broadcast %217 : vector<2x8x1xf32> to vector<2x8x8xf32>
    %219 = arith.mulf %214, %218 : vector<2x8x8xf32>
    "tpu.trace_start"() <{level = 10 : i32, message = "bqk,bkd->bqd"}> : () -> ()
    %cst_79 = arith.constant dense<0.000000e+00> : vector<2x8x16xf32>
    %220 = tpu.matmul %219, %204, %cst_79 {dimension_numbers = #tpu.dot_dimension_numbers<[2], [1], [1], [2], [0, 0, 0, 1, 1, 2], [0], [0]>} : vector<2x8x8xf32>, vector<2x8x16xf32>, vector<2x8x16xf32> -> vector<2x8x16xf32>
    "tpu.trace_stop"() : () -> ()
    %221 = vector.shape_cast %220 : vector<2x8x16xf32> to vector<16x16xf32>
    %222 = vector.extract_strided_slice %197 {offsets = [0, 0], sizes = [16, 32], strides = [1, 1]} : vector<32x32xf32> to vector<16x32xf32>
    %cst_80 = arith.constant dense<0.000000e+00> : vector<16x32xf32>
    %223 = tpu.matmul %221, %222, %cst_80 {dimension_numbers = #tpu.dot_dimension_numbers<[1], [0], [0], [1], [0, 0, 1, 1], [], []>} : vector<16x16xf32>, vector<16x32xf32>, vector<16x32xf32> -> vector<16x32xf32>
    %224 = arith.addf %198, %223 : vector<16x32xf32>
    %225 = vector.extract_strided_slice %194 {offsets = [0, 16], sizes = [16, 16], strides = [1, 1]} : vector<16x96xf32> to vector<16x16xf32>
    %226 = vector.shape_cast %225 : vector<16x16xf32> to vector<2x8x16xf32>
    %227 = vector.extract_strided_slice %194 {offsets = [0, 48], sizes = [16, 16], strides = [1, 1]} : vector<16x96xf32> to vector<16x16xf32>
    %228 = vector.shape_cast %227 : vector<16x16xf32> to vector<2x8x16xf32>
    %229 = vector.extract_strided_slice %194 {offsets = [0, 80], sizes = [16, 16], strides = [1, 1]} : vector<16x96xf32> to vector<16x16xf32>
    %230 = vector.shape_cast %229 : vector<16x16xf32> to vector<2x8x16xf32>
    "tpu.trace_start"() <{level = 10 : i32, message = "bqd,bkd->bqk"}> : () -> ()
    %cst_81 = arith.constant dense<0.000000e+00> : vector<2x8x8xf32>
    %231 = tpu.matmul %226, %228, %cst_81 {dimension_numbers = #tpu.dot_dimension_numbers<[2], [2], [1], [1], [0, 0, 0, 1, 1, 1], [0], [0]>} : vector<2x8x16xf32>, vector<2x8x16xf32>, vector<2x8x8xf32> -> vector<2x8x8xf32>
    "tpu.trace_stop"() : () -> ()
    %cst_82 = arith.constant 2.500000e-01 : f32
    %232 = vector.broadcast %cst_82 : f32 to vector<2x8x8xf32>
    %233 = arith.mulf %231, %232 : vector<2x8x8xf32>
    %234 = vector.broadcast %0 : vector<2x1x8xf32> to vector<2x8x8xf32>
    %235 = arith.addf %233, %234 : vector<2x8x8xf32>
    %cst_83 = arith.constant dense<0xFF800000> : vector<2x8xf32>
    %236 = vector.multi_reduction <maximumf>, %235, %cst_83 [2] : vector<2x8x8xf32> to vector<2x8xf32>
    %237 = vector.shape_cast %236 : vector<2x8xf32> to vector<2x8x1xf32>
    %238 = vector.broadcast %237 : vector<2x8x1xf32> to vector<2x8x8xf32>
    %239 = arith.subf %235, %238 : vector<2x8x8xf32>
    %240 = math.exp %239 : vector<2x8x8xf32>
    %cst_84 = arith.constant dense<0.000000e+00> : vector<2x8xf32>
    %241 = vector.multi_reduction <add>, %240, %cst_84 [2] : vector<2x8x8xf32> to vector<2x8xf32>
    %242 = vector.shape_cast %241 : vector<2x8xf32> to vector<2x8x1xf32>
    %243 = tpu.reciprocal %242 {approx = true} : vector<2x8x1xf32> -> vector<2x8x1xf32>
    %244 = vector.broadcast %243 : vector<2x8x1xf32> to vector<2x8x8xf32>
    %245 = arith.mulf %240, %244 : vector<2x8x8xf32>
    "tpu.trace_start"() <{level = 10 : i32, message = "bqk,bkd->bqd"}> : () -> ()
    %cst_85 = arith.constant dense<0.000000e+00> : vector<2x8x16xf32>
    %246 = tpu.matmul %245, %230, %cst_85 {dimension_numbers = #tpu.dot_dimension_numbers<[2], [1], [1], [2], [0, 0, 0, 1, 1, 2], [0], [0]>} : vector<2x8x8xf32>, vector<2x8x16xf32>, vector<2x8x16xf32> -> vector<2x8x16xf32>
    "tpu.trace_stop"() : () -> ()
    %247 = vector.shape_cast %246 : vector<2x8x16xf32> to vector<16x16xf32>
    %248 = vector.extract_strided_slice %197 {offsets = [16, 0], sizes = [16, 32], strides = [1, 1]} : vector<32x32xf32> to vector<16x32xf32>
    %cst_86 = arith.constant dense<0.000000e+00> : vector<16x32xf32>
    %249 = tpu.matmul %247, %248, %cst_86 {dimension_numbers = #tpu.dot_dimension_numbers<[1], [0], [0], [1], [0, 0, 1, 1], [], []>} : vector<16x16xf32>, vector<16x32xf32>, vector<16x32xf32> -> vector<16x32xf32>
    %250 = arith.addf %224, %249 : vector<16x32xf32>
    %251 = arith.index_cast %c1_i32 : i32 to index
    %c0_87 = arith.constant 0 : index
    %c0_88 = arith.constant 0 : index
    %252 = vector.load %arg8[%251, %c0_87, %c0_88] : memref<2x1x32xf32, #tpu.memory_space<vmem>>, vector<1x1x32xf32>
    %253 = vector.shape_cast %252 : vector<1x1x32xf32> to vector<1x32xf32>
    %254 = vector.broadcast %253 : vector<1x32xf32> to vector<16x32xf32>
    %255 = arith.addf %250, %254 : vector<16x32xf32>
    %256 = arith.addf %185, %255 : vector<16x32xf32>
    %257 = arith.index_cast %c1_i32 : i32 to index
    %c0_89 = arith.constant 0 : index
    %c0_90 = arith.constant 0 : index
    %258 = vector.load %arg9[%257, %c0_89, %c0_90] : memref<2x1x32xf32, #tpu.memory_space<vmem>>, vector<1x1x32xf32>
    %259 = vector.shape_cast %258 : vector<1x1x32xf32> to vector<1x32xf32>
    %260 = arith.index_cast %c1_i32 : i32 to index
    %c0_91 = arith.constant 0 : index
    %c0_92 = arith.constant 0 : index
    %261 = vector.load %arg10[%260, %c0_91, %c0_92] : memref<2x1x32xf32, #tpu.memory_space<vmem>>, vector<1x1x32xf32>
    %262 = vector.shape_cast %261 : vector<1x1x32xf32> to vector<1x32xf32>
    %cst_93 = arith.constant dense<0.000000e+00> : vector<16xf32>
    %263 = vector.multi_reduction <add>, %256, %cst_93 [1] : vector<16x32xf32> to vector<16xf32>
    %264 = vector.shape_cast %263 : vector<16xf32> to vector<16x1xf32>
    %cst_94 = arith.constant 3.200000e+01 : f32
    %265 = vector.broadcast %cst_94 : f32 to vector<16x1xf32>
    %266 = arith.divf %264, %265 : vector<16x1xf32>
    %267 = vector.broadcast %266 : vector<16x1xf32> to vector<16x32xf32>
    %268 = arith.subf %256, %267 : vector<16x32xf32>
    %269 = arith.mulf %268, %268 : vector<16x32xf32>
    %cst_95 = arith.constant dense<0.000000e+00> : vector<16xf32>
    %270 = vector.multi_reduction <add>, %269, %cst_95 [1] : vector<16x32xf32> to vector<16xf32>
    %271 = vector.shape_cast %270 : vector<16xf32> to vector<16x1xf32>
    %cst_96 = arith.constant 3.200000e+01 : f32
    %272 = vector.broadcast %cst_96 : f32 to vector<16x1xf32>
    %273 = arith.divf %271, %272 : vector<16x1xf32>
    %274 = vector.broadcast %266 : vector<16x1xf32> to vector<16x32xf32>
    %275 = arith.subf %256, %274 : vector<16x32xf32>
    %cst_97 = arith.constant 9.99999996E-13 : f32
    %276 = vector.broadcast %cst_97 : f32 to vector<16x1xf32>
    %277 = arith.addf %273, %276 : vector<16x1xf32>
    %278 = math.rsqrt %277 : vector<16x1xf32>
    %279 = vector.broadcast %278 : vector<16x1xf32> to vector<16x32xf32>
    %280 = arith.mulf %275, %279 : vector<16x32xf32>
    %281 = vector.broadcast %259 : vector<1x32xf32> to vector<16x32xf32>
    %282 = arith.mulf %280, %281 : vector<16x32xf32>
    %283 = vector.broadcast %262 : vector<1x32xf32> to vector<16x32xf32>
    %284 = arith.addf %282, %283 : vector<16x32xf32>
    %285 = arith.index_cast %c1_i32 : i32 to index
    %c0_98 = arith.constant 0 : index
    %c0_99 = arith.constant 0 : index
    %286 = vector.load %arg11[%285, %c0_98, %c0_99] : memref<2x32x128xf32, #tpu.memory_space<vmem>>, vector<1x32x128xf32>
    %287 = vector.shape_cast %286 : vector<1x32x128xf32> to vector<32x128xf32>
    %cst_100 = arith.constant dense<0.000000e+00> : vector<16x128xf32>
    %288 = tpu.matmul %284, %287, %cst_100 {dimension_numbers = #tpu.dot_dimension_numbers<[1], [0], [0], [1], [0, 0, 1, 1], [], []>} : vector<16x32xf32>, vector<32x128xf32>, vector<16x128xf32> -> vector<16x128xf32>
    %289 = arith.index_cast %c1_i32 : i32 to index
    %c0_101 = arith.constant 0 : index
    %c0_102 = arith.constant 0 : index
    %290 = vector.load %arg12[%289, %c0_101, %c0_102] : memref<2x1x128xf32, #tpu.memory_space<vmem>>, vector<1x1x128xf32>
    %291 = vector.shape_cast %290 : vector<1x1x128xf32> to vector<1x128xf32>
    %292 = vector.broadcast %291 : vector<1x128xf32> to vector<16x128xf32>
    %293 = arith.addf %288, %292 : vector<16x128xf32>
    %cst_103 = arith.constant 5.000000e-01 : f32
    %294 = vector.broadcast %cst_103 : f32 to vector<16x128xf32>
    %295 = arith.mulf %294, %293 : vector<16x128xf32>
    %cst_104 = arith.constant 4.471500e-02 : f32
    %296 = vector.broadcast %cst_104 : f32 to vector<16x128xf32>
    %297 = arith.mulf %296, %293 : vector<16x128xf32>
    %298 = arith.mulf %297, %293 : vector<16x128xf32>
    %299 = arith.mulf %298, %293 : vector<16x128xf32>
    %300 = arith.addf %293, %299 : vector<16x128xf32>
    %cst_105 = arith.constant 0.797884583 : f32
    %301 = vector.broadcast %cst_105 : f32 to vector<16x128xf32>
    %302 = arith.mulf %301, %300 : vector<16x128xf32>
    %303 = math.tanh %302 : vector<16x128xf32>
    %cst_106 = arith.constant 1.000000e+00 : f32
    %304 = vector.broadcast %cst_106 : f32 to vector<16x128xf32>
    %305 = arith.addf %304, %303 : vector<16x128xf32>
    %306 = arith.mulf %295, %305 : vector<16x128xf32>
    %307 = arith.index_cast %c1_i32 : i32 to index
    %c0_107 = arith.constant 0 : index
    %c0_108 = arith.constant 0 : index
    %308 = vector.load %arg13[%307, %c0_107, %c0_108] : memref<2x128x32xf32, #tpu.memory_space<vmem>>, vector<1x128x32xf32>
    %309 = vector.shape_cast %308 : vector<1x128x32xf32> to vector<128x32xf32>
    %cst_109 = arith.constant dense<0.000000e+00> : vector<16x32xf32>
    %310 = tpu.matmul %306, %309, %cst_109 {dimension_numbers = #tpu.dot_dimension_numbers<[1], [0], [0], [1], [0, 0, 1, 1], [], []>} : vector<16x128xf32>, vector<128x32xf32>, vector<16x32xf32> -> vector<16x32xf32>
    %311 = arith.index_cast %c1_i32 : i32 to index
    %c0_110 = arith.constant 0 : index
    %c0_111 = arith.constant 0 : index
    %312 = vector.load %arg14[%311, %c0_110, %c0_111] : memref<2x1x32xf32, #tpu.memory_space<vmem>>, vector<1x1x32xf32>
    %313 = vector.shape_cast %312 : vector<1x1x32xf32> to vector<1x32xf32>
    %314 = vector.broadcast %313 : vector<1x32xf32> to vector<16x32xf32>
    %315 = arith.addf %310, %314 : vector<16x32xf32>
    %316 = arith.addf %284, %315 : vector<16x32xf32>
    %317 = arith.index_cast %c1_i32 : i32 to index
    %c0_112 = arith.constant 0 : index
    %c0_113 = arith.constant 0 : index
    %318 = vector.load %arg15[%317, %c0_112, %c0_113] : memref<2x1x32xf32, #tpu.memory_space<vmem>>, vector<1x1x32xf32>
    %319 = vector.shape_cast %318 : vector<1x1x32xf32> to vector<1x32xf32>
    %320 = arith.index_cast %c1_i32 : i32 to index
    %c0_114 = arith.constant 0 : index
    %c0_115 = arith.constant 0 : index
    %321 = vector.load %arg16[%320, %c0_114, %c0_115] : memref<2x1x32xf32, #tpu.memory_space<vmem>>, vector<1x1x32xf32>
    %322 = vector.shape_cast %321 : vector<1x1x32xf32> to vector<1x32xf32>
    %cst_116 = arith.constant dense<0.000000e+00> : vector<16xf32>
    %323 = vector.multi_reduction <add>, %316, %cst_116 [1] : vector<16x32xf32> to vector<16xf32>
    %324 = vector.shape_cast %323 : vector<16xf32> to vector<16x1xf32>
    %cst_117 = arith.constant 3.200000e+01 : f32
    %325 = vector.broadcast %cst_117 : f32 to vector<16x1xf32>
    %326 = arith.divf %324, %325 : vector<16x1xf32>
    %327 = vector.broadcast %326 : vector<16x1xf32> to vector<16x32xf32>
    %328 = arith.subf %316, %327 : vector<16x32xf32>
    %329 = arith.mulf %328, %328 : vector<16x32xf32>
    %cst_118 = arith.constant dense<0.000000e+00> : vector<16xf32>
    %330 = vector.multi_reduction <add>, %329, %cst_118 [1] : vector<16x32xf32> to vector<16xf32>
    %331 = vector.shape_cast %330 : vector<16xf32> to vector<16x1xf32>
    %cst_119 = arith.constant 3.200000e+01 : f32
    %332 = vector.broadcast %cst_119 : f32 to vector<16x1xf32>
    %333 = arith.divf %331, %332 : vector<16x1xf32>
    %334 = vector.broadcast %326 : vector<16x1xf32> to vector<16x32xf32>
    %335 = arith.subf %316, %334 : vector<16x32xf32>
    %cst_120 = arith.constant 9.99999996E-13 : f32
    %336 = vector.broadcast %cst_120 : f32 to vector<16x1xf32>
    %337 = arith.addf %333, %336 : vector<16x1xf32>
    %338 = math.rsqrt %337 : vector<16x1xf32>
    %339 = vector.broadcast %338 : vector<16x1xf32> to vector<16x32xf32>
    %340 = arith.mulf %335, %339 : vector<16x32xf32>
    %341 = vector.broadcast %319 : vector<1x32xf32> to vector<16x32xf32>
    %342 = arith.mulf %340, %341 : vector<16x32xf32>
    %343 = vector.broadcast %322 : vector<1x32xf32> to vector<16x32xf32>
    %344 = arith.addf %342, %343 : vector<16x32xf32>
    %c2_i32 = arith.constant 2 : i32
    %c0_121 = arith.constant 0 : index
    %c0_122 = arith.constant 0 : index
    %345 = vector.load %arg17[%c0_121, %c0_122] : memref<32x32xf32, #tpu.memory_space<vmem>>, vector<32x32xf32>
    %cst_123 = arith.constant dense<0.000000e+00> : vector<16x32xf32>
    %346 = tpu.matmul %344, %345, %cst_123 {dimension_numbers = #tpu.dot_dimension_numbers<[1], [0], [0], [1], [0, 0, 1, 1], [], []>} : vector<16x32xf32>, vector<32x32xf32>, vector<16x32xf32> -> vector<16x32xf32>
    %c0_124 = arith.constant 0 : index
    %c0_125 = arith.constant 0 : index
    %347 = vector.load %arg18[%c0_124, %c0_125] : memref<1x32xf32, #tpu.memory_space<vmem>>, vector<1x32xf32>
    %348 = vector.broadcast %347 : vector<1x32xf32> to vector<16x32xf32>
    %349 = arith.addf %346, %348 : vector<16x32xf32>
    %350 = math.tanh %349 : vector<16x32xf32>
    %c0_126 = arith.constant 0 : index
    %c0_127 = arith.constant 0 : index
    %351 = vector.load %arg19[%c0_126, %c0_127] : memref<1x32xf32, #tpu.memory_space<vmem>>, vector<1x32xf32>
    "tpu.trace_start"() <{level = 10 : i32, message = "qd,kd->qk"}> : () -> ()
    %cst_128 = arith.constant dense<0.000000e+00> : vector<1x16xf32>
    %352 = tpu.matmul %351, %350, %cst_128 {dimension_numbers = #tpu.dot_dimension_numbers<[1], [1], [0], [0], [0, 0, 1, 0], [], []>} : vector<1x32xf32>, vector<16x32xf32>, vector<1x16xf32> -> vector<1x16xf32>
    "tpu.trace_stop"() : () -> ()
    %c0_129 = arith.constant 0 : index
    %c0_130 = arith.constant 0 : index
    %353 = vector.load %arg2[%c0_129, %c0_130] : memref<2x16xf32, #tpu.memory_space<vmem>>, vector<2x16xf32>
    %cst_131 = arith.constant 5.000000e-01 : f32
    %354 = vector.broadcast %cst_131 : f32 to vector<2x16xf32>
    %355 = arith.cmpf ogt, %353, %354 : vector<2x16xf32>
    %cst_132 = arith.constant -1.000000e+09 : f32
    %356 = vector.shape_cast %352 : vector<1x16xf32> to vector<1x16xf32>
    %357 = vector.broadcast %356 : vector<1x16xf32> to vector<2x16xf32>
    %358 = vector.broadcast %cst_132 : f32 to vector<2x16xf32>
    %359 = arith.select %355, %357, %358 : vector<2x16xi1>, vector<2x16xf32>
    %cst_133 = arith.constant dense<0xFF800000> : vector<2xf32>
    %360 = vector.multi_reduction <maximumf>, %359, %cst_133 [1] : vector<2x16xf32> to vector<2xf32>
    %361 = vector.shape_cast %360 : vector<2xf32> to vector<2x1xf32>
    %362 = vector.broadcast %361 : vector<2x1xf32> to vector<2x16xf32>
    %363 = arith.subf %359, %362 : vector<2x16xf32>
    %364 = math.exp %363 : vector<2x16xf32>
    %cst_134 = arith.constant dense<0.000000e+00> : vector<2xf32>
    %365 = vector.multi_reduction <add>, %364, %cst_134 [1] : vector<2x16xf32> to vector<2xf32>
    %366 = vector.shape_cast %365 : vector<2xf32> to vector<2x1xf32>
    %367 = tpu.reciprocal %366 {approx = true} : vector<2x1xf32> -> vector<2x1xf32>
    %368 = vector.broadcast %367 : vector<2x1xf32> to vector<2x16xf32>
    %369 = arith.mulf %364, %368 : vector<2x16xf32>
    %cst_135 = arith.constant dense<0.000000e+00> : vector<2x32xf32>
    %370 = tpu.matmul %369, %344, %cst_135 {dimension_numbers = #tpu.dot_dimension_numbers<[1], [0], [0], [1], [0, 0, 1, 1], [], []>} : vector<2x16xf32>, vector<16x32xf32>, vector<2x32xf32> -> vector<2x32xf32>
    %c0_136 = arith.constant 0 : index
    %c0_137 = arith.constant 0 : index
    %371 = vector.load %arg20[%c0_136, %c0_137] : memref<32x8xf32, #tpu.memory_space<vmem>>, vector<32x8xf32>
    %cst_138 = arith.constant dense<0.000000e+00> : vector<2x8xf32>
    %372 = tpu.matmul %370, %371, %cst_138 {dimension_numbers = #tpu.dot_dimension_numbers<[1], [0], [0], [1], [0, 0, 1, 1], [], []>} : vector<2x32xf32>, vector<32x8xf32>, vector<2x8xf32> -> vector<2x8xf32>
    %c0_139 = arith.constant 0 : index
    %c0_140 = arith.constant 0 : index
    %373 = vector.load %arg21[%c0_139, %c0_140] : memref<1x8xf32, #tpu.memory_space<vmem>>, vector<1x8xf32>
    %374 = vector.broadcast %373 : vector<1x8xf32> to vector<2x8xf32>
    %375 = arith.addf %372, %374 : vector<2x8xf32>
    %cst_141 = arith.constant 0.000000e+00 : f32
    %376 = vector.broadcast %cst_141 : f32 to vector<2x8xf32>
    %377 = arith.maximumf %375, %376 : vector<2x8xf32>
    %c0_142 = arith.constant 0 : index
    %c0_143 = arith.constant 0 : index
    %378 = vector.load %arg22[%c0_142, %c0_143] : memref<8x128xf32, #tpu.memory_space<vmem>>, vector<8x128xf32>
    %cst_144 = arith.constant dense<0.000000e+00> : vector<2x128xf32>
    %379 = tpu.matmul %377, %378, %cst_144 {dimension_numbers = #tpu.dot_dimension_numbers<[1], [0], [0], [1], [0, 0, 1, 1], [], []>} : vector<2x8xf32>, vector<8x128xf32>, vector<2x128xf32> -> vector<2x128xf32>
    %c0_145 = arith.constant 0 : index
    %c0_146 = arith.constant 0 : index
    %380 = vector.load %arg23[%c0_145, %c0_146] : memref<1x128xf32, #tpu.memory_space<vmem>>, vector<1x128xf32>
    %381 = vector.broadcast %380 : vector<1x128xf32> to vector<2x128xf32>
    %382 = arith.addf %379, %381 : vector<2x128xf32>
    %c0_147 = arith.constant 0 : index
    %c0_148 = arith.constant 0 : index
    %383 = vector.load %arg24[%c0_147, %c0_148] : memref<2x128xf32, #tpu.memory_space<vmem>>, vector<2x128xf32>
    tpu.vector_store %arg24[%c0_147, %c0_148], %382 {strides = array<i32>} : memref<2x128xf32, #tpu.memory_space<vmem>>, vector<2x128xf32>,
    return
  }
}

</mosaic_0001>

<bundles_post_ra>
// kernel: mul.7
= control target key start
LH: loop header
LB: loop body
LE: loop exit
PB: predicated region body
PF: predicated region fallthrough
CT: control target
= control target key end

     0   :  { %vm7_vm0 = vcmask 64512   ;;  %vm13_vm1 = vcmask 130112   ;;  %s39_s0 = inlined_call_operand.vmem [shape: f32[2,8], index: 0, kind: input, shape index: {}]   ;;  %s40_s1 = inlined_call_operand.vmem [shape: f32[16], index: 1, kind: output, shape index: {}]  }
   0x1   :  { %v4_v0 = vld [vmem:[%s39_s0] sm:$0x3]  ;;  %s22_s0 = smov 8  }
   0x2   :  { %5 = vst [vmem:[#allocation1] sm:$0x3] %v4_v0 }
   0x9   :  { %v10_v1 = vld [vmem:[#allocation1 + $0x1] sm:$0x1]   ;;  %v6_v2 = vld [vmem:[#allocation1] sm:$0x1]  }
   0xa   :  { %11 = vrot.lane.b32.xlu0 %v10_v1, %s22_s0  ;;  %8 = vst.msk [vmem:[#allocation0] sm:$0x1] %vm7_vm0, %v6_v2  }
  0x7c   :  { %v12_v3 = vpop.permute.xlu0 %11  }
  0x7d   :  { %14 = vst.msk [vmem:[#allocation0] sm:$0x1] %vm13_vm1, %v12_v3  }
  0x84   :  { %v18_v4 = vld [vmem:[#allocation0] sm:$0x1] }
  0x85   :  { %20 = vst [vmem:[%s40_s1] sm:$0x1] %v18_v4 }

// kernel: bert_classifier_forward.1
= control target key start
LH: loop header
LB: loop body
LE: loop exit
PB: predicated region body
PF: predicated region fallthrough
CT: control target
= control target key end

     0   :  { %s4464_s0 = inlined_call_operand.vmem [shape: f32[2,8,32], index: 0, kind: input, shape index: {}]   ;;  %s4465_s1 = inlined_call_operand.vmem [shape: f32[2,1,8], index: 1, kind: input, shape index: {}]   ;;  %s4466_s2 = inlined_call_operand.vmem [shape: f32[2,16], index: 2, kind: input, shape index: {}]   ;;  %s4467_s3 = inlined_call_operand.vmem [shape: f32[1,32], index: 3, kind: input, shape index: {}]   ;;  %s4468_s4 = inlined_call_operand.vmem [shape: f32[1,32], index: 4, kind: input, shape index: {}]   ;;  %s4469_s5 = inlined_call_operand.vmem [shape: f32[2,32,96], index: 5, kind: input, shape index: {}]   ;;  %s4470_s6 = inlined_call_operand.vmem [shape: f32[2,1,96], index: 6, kind: input, shape index: {}]   ;;  %s4471_s7 = inlined_call_operand.vmem [shape: f32[2,32,32], index: 7, kind: input, shape index: {}]   ;;  %s4472_s8 = inlined_call_operand.vmem [shape: f32[2,1,32], index: 8, kind: input, shape index: {}]   ;;  %s4473_s9 = inlined_call_operand.vmem [shape: f32[2,1,32], index: 9, kind: input, shape index: {}]   ;;  %s4474_s10 = inlined_call_operand.vmem [shape: f32[2,1,32], index: 10, kind: input, shape index: {}]   ;;  %s4475_s11 = inlined_call_operand.vmem [shape: f32[2,32,128], index: 11, kind: input, shape index: {}]   ;;  %s4476_s12 = inlined_call_operand.vmem [shape: f32[2,1,128], index: 12, kind: input, shape index: {}]   ;;  %s4477_s13 = inlined_call_operand.vmem [shape: f32[2,128,32], index: 13, kind: input, shape index: {}]   ;;  %s4478_s14 = inlined_call_operand.vmem [shape: f32[2,1,32], index: 14, kind: input, shape index: {}]   ;;  %s4479_s15 = inlined_call_operand.vmem [shape: f32[2,1,32], index: 15, kind: input, shape index: {}]   ;;  %s4480_s16 = inlined_call_operand.vmem [shape: f32[2,1,32], index: 16, kind: input, shape index: {}]   ;;  %s4481_s17 = inlined_call_operand.vmem [shape: f32[32,32], index: 17, kind: input, shape index: {}]   ;;  %s4482_s18 = inlined_call_operand.vmem [shape: f32[1,32], index: 18, kind: input, shape index: {}]   ;;  %s4483_s19 = inlined_call_operand.vmem [shape: f32[1,32], index: 19, kind: input, shape index: {}]   ;;  %s4484_s20 = inlined_call_operand.vmem [shape: f32[32,8], index: 20, kind: input, shape index: {}]   ;;  %s4485_s21 = inlined_call_operand.vmem [shape: f32[1,8], index: 21, kind: input, shape index: {}]   ;;  %s4486_s22 = inlined_call_operand.vmem [shape: f32[8,128], index: 22, kind: input, shape index: {}]   ;;  %s4487_s23 = inlined_call_operand.vmem [shape: f32[1,128], index: 23, kind: input, shape index: {}]   ;;  %s4488_s24 = inlined_call_operand.hbm [shape: f32[2,128], index: 24, kind: output, shape index: {}]  }
   0x1   :  { %4503 = sst [smem:[#allocation5_spill]] %s4464_s0 }
   0x2   :  { %4504 = sst [smem:[#allocation6_spill]] %s4465_s1 }
   0x3   :  { %4505 = sst [smem:[#allocation7_spill]] %s4466_s2 }
   0x4   :  { %4506 = sst [smem:[#allocation8_spill]] %s4467_s3 }
   0x5   :  { %4507 = sst [smem:[#allocation9_spill]] %s4468_s4 }
   0x6   :  { %4508 = sst [smem:[#allocation10_spill]] %s4469_s5 }
   0x7   :  { %4509 = sst [smem:[#allocation11_spill]] %s4470_s6 }
   0x8   :  { %4510 = sst [smem:[#allocation12_spill]] %s4471_s7 }
   0x9   :  { %4511 = sst [smem:[#allocation13_spill]] %s4472_s8 }
   0xa   :  { %s4512_s27 = sld [smem:[#allocation5_spill]]  ;;  %vm84_vm0 = vcmask 261120  }
  0x10   :  { %v80_v0 = vld [vmem:[%s4512_s27] sm:$0xff]  ;;  %v81_v1 = vld [vmem:[%s4512_s27 + $0x8] sm:$0xff] }
  0x11   :  { %29 = vsyncpa [#allocation3], 0  ;;  %v85_v2 = vsel %vm84_vm0, %v80_v0, 0.0  ;;  %v88_v3 = vsel %vm84_vm0, %v81_v1, 0.0  ;;  %s4513_s0 = sld [smem:[#allocation10_spill]]  ;;  %s4514_s26 = sld [smem:[#allocation8_spill]] }
  0x12   :  { %86 = vadd.xlane.f32.xlu0 %v85_v2  ;;  %s4515_s6 = sld [smem:[#allocation9_spill]]  ;;  %v3802_v36 = vmov 0.0   ;;  %vm3803_vm1 = vmmov 0   ;;  %s4516_s7 = sld [smem:[#allocation11_spill]]  ;;  %vm227_vm2 = vcmask 130048   ;;  %vm395_vm3 = vcmask 64512   ;;  %vm3686_vm4 = vmpackc.low %vm84_vm0, %vm84_vm0 }
  0x13   :  { %3312 = vmatprep.subr.mxu1 %v3802_v36  ;;  %3314 = vmatprep.mubr.msk.f32.mxu1 %vm3803_vm1, %v3802_v36  ;;  %s3804_s30 = smov 96   ;;  %s4517_s8 = sld [smem:[#allocation6_spill]]  ;;  %vm2801_vm6 = vcmask 123904  }
  0x14   :  { %s4501_s5 = smov 64   ;;  %s4497_s27 = smov 112  }
  0x15   :  { %s4495_s28 = smov 48   ;;  %s4518_s29 = sld [smem:[#allocation12_spill]] }
  0x16   :  { %89 = vadd.xlane.f32.xlu0 %v88_v3  ;;  %s4522_s1 = smov 112   ;;  %s4524_s2 = sld [smem:[#allocation7_spill]] }
  0x17   :  { %v128_v14 = vld [vmem:[%s4513_s0] sm:$0xff]  ;;  %v129_v15 = vld [vmem:[%s4513_s0 + $0x8] sm:$0xff]  ;;  %v130_v16 = vld [vmem:[%s4513_s0 + $0x10] sm:$0xff] }
  0x18   :  { %v3564_v17 = vpack.c.bf16 %v129_v15, %v128_v14  ;;  %v131_v18 = vld [vmem:[%s4513_s0 + $0x18] sm:$0xff]  ;;  %v3067_v27 = vld [vmem:[%s4514_s26] ss:$0 sm:$0xff]  ;;  %s4499_s26 = smov 80  }
  0x19   :  { %v3568_v19 = vpack.c.bf16 %v131_v18, %v130_v16  ;;  %v3068_v29 = vld [vmem:[%s4515_s6] ss:$0 sm:$0xff]  ;;  %v4010_v50 = vld [vmem:[%s4517_s8 + $0x1] ss:$0 sm:$0xff]  ;;  %s4523_s6 = smov 48  }
  0x1a   :  { %3565 = vmatprep.subr.bf16.mxu0 %v3564_v17  ;;  %v3069_v37 = vld [vmem:[%s4516_s7] ss:$0 sm:$0xff] }
  0x1b   :  { %3567 = vmatpush3.bf16.msra.mxu0 %v3564_v17  ;;  %v4004_v45 = vld [vmem:[%s4517_s8] ss:$0 sm:$0xff] }
  0x1c   :  { %3569 = vmatprep.subr.bf16.mxu0 %v3568_v19 }
  0x1f   :  { %3571 = vmatpush3.bf16.msra.mxu0 %v3568_v19 }
  0x20   :  { %3322 = vmatprep.subr.mxu0 %v3802_v36 }
  0x9f   :  { %v87_v4 = vpop.xlane.xlu0 %86 }
  0xa0   :  { %v92_v5 = vmul.f32 0.03125, %v87_v4 }
  0xa2   :  { %v94_v6 = vsub.f32 %v80_v0, %v92_v5 }
  0xa3   :  { %v90_v7 = vpop.xlane.xlu0 %89 }
  0xa4   :  { %v93_v8 = vmul.f32 0.03125, %v90_v7  ;;  %v96_v9 = vmul.f32 %v94_v6, %v94_v6 }
  0xa6   :  { %v95_v10 = vsub.f32 %v81_v1, %v93_v8  ;;  %v98_v11 = vsel %vm84_vm0, %v96_v9, 0.0 }
  0xa7   :  { %99 = vadd.xlane.f32.xlu1 %v98_v11 }
  0xa8   :  { %v97_v12 = vmul.f32 %v95_v10, %v95_v10 }
  0xaa   :  { %v101_v13 = vsel %vm84_vm0, %v97_v12, 0.0 }
  0xab   :  { %102 = vadd.xlane.f32.xlu1 %v101_v13 }
 0x134   :  { %v100_v20 = vpop.xlane.xlu1 %99 }
 0x135   :  { %v104_v21 = vmul.f32 0.03125, %v100_v20 }
 0x137   :  { %v106_v22 = vadd.f32 1e-12, %v104_v21 }
 0x138   :  { %v103_v23 = vpop.xlane.xlu1 %102 }
 0x139   :  { %3710 = vrsqrt.f32 %v106_v22  ;;  %v105_v24 = vmul.f32 0.03125, %v103_v23 }
 0x13b   :  { %v107_v25 = vadd.f32 1e-12, %v105_v24 }
 0x13d   :  { %3712 = vrsqrt.f32 %v107_v25 }
 0x143   :  { %v3711_v26 = vpop.eup %3710 }
 0x144   :  { %v110_v28 = vmul.f32 %v3711_v26, %v94_v6 }
 0x146   :  { %v118_v30 = vmul.f32 %v3067_v27, %v110_v28 }
 0x147   :  { %v3713_v31 = vpop.eup %3712 }
 0x148   :  { %v111_v32 = vmul.f32 %v3713_v31, %v95_v10  ;;  %v3964_v33 = vadd.f32 %v3068_v29, %v118_v30 }
 0x14a   :  { %v119_v34 = vmul.f32 %v3067_v27, %v111_v32  ;;  %3309 = vmatprep.mubr.msk.f32.mxu0 %vm84_vm0, %v3964_v33 }
 0x14c   :  { %v3968_v35 = vadd.f32 %v3068_v29, %v119_v34 }
 0x14e   :  { %3310 = vmatmul.mubr.msk.f32.vlgmr.msra.gmra.mrb[0].mxu0 %vm84_vm0, %v3968_v35 }
 0x14f   :  { %3324 = vmatprep.mubr.msk.f32.mxu0 %vm3803_vm1, %v3802_v36 }
 0x221   :  { %v3311_v38 = vpop.f32.mrb[0].mxu0 }
 0x222   :  { %v3981_v39 = vadd.f32 %v3311_v38, %v3069_v37  ;;  %v211_v40 = vpop.f32.mrb[1].mxu0 }
 0x223   :  { %v3983_v41 = vadd.f32 %v3069_v37, %v211_v40 }
 0x224   :  { %303 = vrot.lane.b32.xlu1 %v3981_v39, %s3804_s30 }
 0x225   :  { %225 = vrot.lane.b32.xlu0 %v3983_v41, %s3804_s30 }
 0x296   :  { %v304_v43 = vpop.permute.xlu1 %303 }
 0x297   :  { %v226_v42 = vpop.permute.xlu0 %225 }
 0x298   :  { %3313 = vmatpush3.xpose.msk.msra.mxu1 %vm227_vm2, %v226_v42 }
 0x299   :  { %3317 = vmatprep.subr.mxu1 %v3802_v36 }
 0x29b   :  { %3315 = vmatmul.mubr.msk.f32.vlgmr.msra.gmra.mrb[0].mxu1 %vm227_vm2, %v3983_v41 }
 0x29c   :  { %3318 = vmatpush3.xpose.msk.msra.mxu1 %vm227_vm2, %v304_v43  ;;  %3319 = vmatprep.mubr.msk.f32.mxu1 %vm3803_vm1, %v3802_v36 }
 0x29d   :  { %3327 = vmatprep.subr.mxu1 %v3802_v36 }
 0x29f   :  { %3320 = vmatmul.mubr.msk.f32.vlgmr.msra.gmra.mrb[2].mxu1 %vm227_vm2, %v3981_v39 }
 0x2a0   :  { %3329 = vmatprep.mubr.msk.f32.mxu1 %vm3803_vm1, %v3802_v36 }
 0x36e   :  { %v298_v44 = vpop.f32.mrb[0].mxu1 }
 0x36f   :  { %v379_v46 = vmul.f32 0.25, %v298_v44  ;;  %v3316_v47 = vpop.f32.mrb[1].mxu1 }
 0x371   :  { %v393_v48 = vadd.f32 %v4004_v45, %v379_v46 }
 0x372   :  { %v375_v49 = vpop.f32.mrb[2].mxu1 }
 0x373   :  { %v380_v51 = vmul.f32 0.25, %v375_v49  ;;  %v3321_v52 = vpop.f32.mrb[3].mxu1  ;;  %v396_v53 = vsel %vm395_vm3, %v393_v48, -inf }
 0x374   :  { %397 = vmax.xlane.f32.xlu1 %v396_v53  ;;  %v222_v52 = vld [vmem:[%s4518_s29 + $0x10] sm:$0xff] }
 0x375   :  { %v394_v54 = vadd.f32 %v4010_v50, %v380_v51 }
 0x377   :  { %v399_v55 = vsel %vm395_vm3, %v394_v54, -inf }
 0x378   :  { %400 = vmax.xlane.f32.xlu0 %v399_v55  ;;  %v221_v55 = vld [vmem:[%s4518_s29 + $0x8] sm:$0xff] }
 0x385   :  { %494 = vrot.lane.b32.xlu1 %v3981_v39, %s4501_s5 }
 0x389   :  { %572 = vrot.lane.b32.xlu1 %v3983_v41, %s4499_s26 }
 0x38d   :  { %650 = vrot.lane.b32.xlu1 %v3981_v39, %s4499_s26 }
 0x38e   :  { %418 = vrot.lane.b32.xlu0 %v3983_v41, %s4501_s5 }
 0x401   :  { %v398_v56 = vpop.xlane.xlu1 %397 }
 0x402   :  { %v402_v57 = vsub.f32 %v393_v48, %v398_v56 }
 0x404   :  { %v404_v58 = vmul.f32 1.442695, %v402_v57 }
 0x405   :  { %v401_v59 = vpop.xlane.xlu0 %400  ;;  %v495_v60 = vpop.permute.xlu1 %494 }
 0x406   :  { %3714 = vpow2.f32 %v404_v58  ;;  %v403_v61 = vsub.f32 %v394_v54, %v401_v59  ;;  %3328 = vmatpush3.msra.mxu1 %v495_v60  ;;  %v220_v54 = vld [vmem:[%s4518_s29] sm:$0xff] }
 0x407   :  { %3337 = vmatprep.subr.mxu1 %v3802_v36  ;;  %v3576_v56 = vpack.c.bf16 %v221_v55, %v220_v54  ;;  %v1240_v54 = vld [vmem:[%s4477_s13 + $0x48] sm:$0xff] }
 0x408   :  { %v406_v62 = vmul.f32 1.442695, %v403_v61 }
 0x409   :  { %v419_v63 = vpop.permute.xlu0 %418  ;;  %v573_v4 = vpop.permute.xlu1 %572 }
 0x40a   :  { %3716 = vpow2.f32 %v406_v62  ;;  %3323 = vmatpush3.msra.mxu0 %v419_v63 }
 0x40b   :  { %3332 = vmatprep.subr.mxu0 %v3802_v36 }
 0x40d   :  { %v651_v5 = vpop.permute.xlu1 %650 }
 0x410   :  { %v3715_v0 = vpop.eup %3714 }
 0x411   :  { %v408_v1 = vsel %vm395_vm3, %v3715_v0, 0.0 }
 0x412   :  { %409 = vadd.xlane.f32.xlu0 %v408_v1 }
 0x414   :  { %v3717_v2 = vpop.eup %3716 }
 0x415   :  { %v411_v3 = vsel %vm395_vm3, %v3717_v2, 0.0 }
 0x416   :  { %412 = vadd.xlane.f32.xlu1 %v411_v3 }
 0x427   :  { %648 = vrot.lane.b32.xlu1 %v3981_v39, %s4497_s27 }
 0x428   :  { %570 = vrot.lane.b32.xlu0 %v3983_v41, %s4497_s27 }
 0x49f   :  { %v410_v6 = vpop.xlane.xlu0 %409 }
 0x4a0   :  { %3718 = vrcp.f32 %v410_v6 }
 0x4a3   :  { %v413_v7 = vpop.xlane.xlu1 %412  ;;  %v571_v12 = vpop.permute.xlu0 %570 }
 0x4a4   :  { %3720 = vrcp.f32 %v413_v7 }
 0x4a7   :  { %v649_v13 = vpop.permute.xlu1 %648 }
 0x4aa   :  { %v3719_v8 = vpop.eup %3718 }
 0x4ab   :  { %v416_v9 = vmul.f32 %v3719_v8, %v3715_v0 }
 0x4ad   :  { %3325 = vmatmul.mubr.msk.f32.vlgmr.msra.gmra.mrb[2].mxu0 %vm395_vm3, %v416_v9 }
 0x4ae   :  { %v3721_v10 = vpop.eup %3720  ;;  %3333 = vmatpush3.xpose.msk.msra.mxu0 %vm227_vm2, %v573_v4  ;;  %3334 = vmatprep.mubr.msk.f32.mxu0 %vm3803_vm1, %v3802_v36 }
 0x4af   :  { %v417_v11 = vmul.f32 %v3721_v10, %v3717_v2  ;;  %3342 = vmatprep.subr.mxu0 %v3802_v36 }
 0x4b1   :  { %3330 = vmatmul.mubr.msk.f32.vlgmr.msra.gmra.mrb[4].mxu1 %vm395_vm3, %v417_v11  ;;  %3335 = vmatmul.mubr.msk.f32.vlgmr.msra.gmra.mrb[4].mxu0 %vm227_vm2, %v571_v12 }
 0x4b2   :  { %3338 = vmatpush3.xpose.msk.msra.mxu1 %vm227_vm2, %v651_v5  ;;  %3339 = vmatprep.mubr.msk.f32.mxu1 %vm3803_vm1, %v3802_v36 }
 0x4b3   :  { %3347 = vmatprep.subr.mxu1 %v3802_v36  ;;  %3344 = vmatprep.mubr.msk.f32.mxu0 %vm3803_vm1, %v3802_v36 }
 0x4b5   :  { %3340 = vmatmul.mubr.msk.f32.vlgmr.msra.gmra.mrb[6].mxu1 %vm227_vm2, %v649_v13 }
 0x4b6   :  { %3349 = vmatprep.mubr.msk.f32.mxu1 %vm3803_vm1, %v3802_v36 }
 0x580   :  { %v4047_v14 = vpop.f32.mrb[2].mxu0 }
 0x581   :  { %v3326_v15 = vpop.f32.mrb[3].mxu0 }
 0x582   :  { %v1122_v15 = vld [vmem:[%s4475_s11 + $0x8] sm:$0xff] }
 0x584   :  { %v566_v16 = vpop.f32.mrb[4].mxu1  ;;  %v644_v17 = vpop.f32.mrb[4].mxu0 }
 0x585   :  { %v726_v18 = vmul.f32 0.25, %v644_v17  ;;  %v3331_v19 = vpop.f32.mrb[5].mxu1  ;;  %v3336_v20 = vpop.f32.mrb[5].mxu0  ;;  %v1123_v17 = vld [vmem:[%s4475_s11 + $0x10] sm:$0xff] }
 0x586   :  { %v1231_v20 = vld [vmem:[%s4477_s13] sm:$0xff] }
 0x587   :  { %v728_v21 = vadd.f32 %v4004_v45, %v726_v18  ;;  %v1124_v18 = vld [vmem:[%s4475_s11 + $0x18] sm:$0xff] }
 0x588   :  { %v722_v22 = vpop.f32.mrb[6].mxu1  ;;  %v3584_v19 = vpack.c.bf16 %v1124_v18, %v1123_v17 }
 0x589   :  { %v727_v23 = vmul.f32 0.25, %v722_v22  ;;  %v3341_v24 = vpop.f32.mrb[7].mxu1  ;;  %v730_v25 = vsel %vm395_vm3, %v728_v21, -inf }
 0x58a   :  { %731 = vmax.xlane.f32.xlu0 %v730_v25 }
 0x58b   :  { %v729_v26 = vadd.f32 %v4010_v50, %v727_v23 }
 0x58d   :  { %v733_v27 = vsel %vm395_vm3, %v729_v26, -inf }
 0x58e   :  { %734 = vmax.xlane.f32.xlu1 %v733_v27 }
 0x59f   :  { %828 = vrot.lane.b32.xlu1 %v3981_v39, %s4495_s28 }
 0x617   :  { %v732_v28 = vpop.xlane.xlu0 %731 }
 0x618   :  { %v736_v29 = vsub.f32 %v728_v21, %v732_v28  ;;  %v1232_v21 = vld [vmem:[%s4477_s13 + $0x8] sm:$0xff] }
 0x619   :  { %v3588_v22 = vpack.c.bf16 %v1232_v21, %v1231_v20 }
 0x61a   :  { %v738_v30 = vmul.f32 1.442695, %v736_v29 }
 0x61b   :  { %v735_v31 = vpop.xlane.xlu1 %734 }
 0x61c   :  { %3722 = vpow2.f32 %v738_v30  ;;  %v737_v32 = vsub.f32 %v729_v26, %v735_v31  ;;  %v3091_v30 = vld [vmem:[%s4473_s9] ss:$0 sm:$0xff] }
 0x61e   :  { %v740_v34 = vmul.f32 1.442695, %v737_v32 }
 0x61f   :  { %v829_v37 = vpop.permute.xlu1 %828 }
 0x620   :  { %3724 = vpow2.f32 %v740_v34  ;;  %3348 = vmatpush3.msra.mxu1 %v829_v37  ;;  %v3092_v37 = vld [vmem:[%s4474_s10] ss:$0 sm:$0xff] }
 0x626   :  { %v3723_v38 = vpop.eup %3722 }
 0x627   :  { %v742_v40 = vsel %vm395_vm3, %v3723_v38, 0.0 }
 0x628   :  { %743 = vadd.xlane.f32.xlu0 %v742_v40 }
 0x62a   :  { %v3725_v42 = vpop.eup %3724 }
 0x62b   :  { %v745_v43 = vsel %vm395_vm3, %v3725_v42, 0.0 }
 0x62c   :  { %746 = vadd.xlane.f32.xlu0 %v745_v43 }
 0x642   :  { %752 = vrot.lane.b32.xlu0 %v3983_v41, %s4495_s28  ;;  %v223_v41 = vld [vmem:[%s4518_s29 + $0x18] sm:$0xff]  ;;  %s4519_s28 = sld [smem:[#allocation13_spill]] }
 0x643   :  { %v3572_v53 = vpack.c.bf16 %v223_v41, %v222_v52  ;;  %v1238_v52 = vld [vmem:[%s4477_s13 + $0x38] sm:$0xff] }
 0x648   :  { %v3090_v61 = vld [vmem:[%s4519_s28] ss:$0 sm:$0xff] }
 0x6b5   :  { %v744_v39 = vpop.xlane.xlu0 %743 }
 0x6b6   :  { %3726 = vrcp.f32 %v744_v39  ;;  %v1233_v39 = vld [vmem:[%s4477_s13 + $0x10] sm:$0xff] }
 0x6b9   :  { %v747_v44 = vpop.xlane.xlu0 %746 }
 0x6ba   :  { %3728 = vrcp.f32 %v747_v44  ;;  %v1234_v44 = vld [vmem:[%s4477_s13 + $0x18] sm:$0xff] }
 0x6bd   :  { %v753_v46 = vpop.permute.xlu0 %752 }
 0x6be   :  { %3343 = vmatpush3.msra.mxu0 %v753_v46  ;;  %v3592_v46 = vpack.c.bf16 %v1234_v44, %v1233_v39 }
 0x6bf   :  { %3573 = vmatprep.subr.bf16.mxu0 %v3572_v53 }
 0x6c0   :  { %v3727_v47 = vpop.eup %3726 }
 0x6c1   :  { %v750_v48 = vmul.f32 %v3727_v47, %v3723_v38  ;;  %v1235_v47 = vld [vmem:[%s4477_s13 + $0x20] sm:$0xff] }
 0x6c3   :  { %3345 = vmatmul.mubr.msk.f32.vlgmr.msra.gmra.mrb[6].mxu0 %vm395_vm3, %v750_v48  ;;  %v1236_v48 = vld [vmem:[%s4477_s13 + $0x28] sm:$0xff] }
 0x6c4   :  { %v3729_v49 = vpop.eup %3728  ;;  %3575 = vmatpush3.bf16.msra.mxu0 %v3572_v53  ;;  %v1239_v53 = vld [vmem:[%s4477_s13 + $0x40] sm:$0xff] }
 0x6c5   :  { %v751_v51 = vmul.f32 %v3729_v49, %v3725_v42  ;;  %3577 = vmatprep.subr.bf16.mxu0 %v3576_v56  ;;  %v3596_v49 = vpack.c.bf16 %v1236_v48, %v1235_v47  ;;  %v3604_v55 = vpack.c.bf16 %v1240_v54, %v1239_v53  ;;  %v3100_v47 = vld [vmem:[%s4513_s0 + $0x28] sm:$0xff] }
 0x6c7   :  { %3350 = vmatmul.mubr.msk.f32.vlgmr.msra.gmra.mrb[8].mxu1 %vm395_vm3, %v751_v51  ;;  %v1237_v51 = vld [vmem:[%s4477_s13 + $0x30] sm:$0xff] }
 0x6c8   :  { %v3600_v41 = vpack.c.bf16 %v1238_v52, %v1237_v51  ;;  %v3102_v51 = vld [vmem:[%s4513_s0 + $0x38] sm:$0xff] }
 0x796   :  { %v824_v57 = vpop.f32.mrb[6].mxu0 }
 0x797   :  { %v3346_v58 = vpop.f32.mrb[7].mxu0  ;;  %3356 = vmatprep.mubr.msk.f32.mxu0 %vm227_vm2, %v824_v57  ;;  %v1242_v57 = vld [vmem:[%s4477_s13 + $0x58] sm:$0xff] }
 0x79a   :  { %v900_v59 = vpop.f32.mrb[8].mxu1 }
 0x79b   :  { %v3351_v60 = vpop.f32.mrb[9].mxu1  ;;  %3357 = vmatmul.mubr.msk.f32.vlgmr.msra.gmra.mrb[8].mxu0 %vm227_vm2, %v900_v59  ;;  %v1243_v59 = vld [vmem:[%s4477_s13 + $0x60] sm:$0xff] }
 0x79c   :  { %3579 = vmatpush3.bf16.msra.mxu0 %v3576_v56  ;;  %3363 = vmatprep.mubr.msk.f32.mxu0 %vm227_vm2, %v4047_v14  ;;  %v1241_v56 = vld [vmem:[%s4477_s13 + $0x50] sm:$0xff]  ;;  %v1244_v60 = vld [vmem:[%s4477_s13 + $0x68] sm:$0xff] }
 0x79d   :  { %3589 = vmatprep.subr.bf16.mxu0 %v3588_v22  ;;  %v3608_v58 = vpack.c.bf16 %v1242_v57, %v1241_v56 }
 0x7a3   :  { %3364 = vmatmul.mubr.msk.f32.vlgmr.msra.gmra.mrb[8].mxu0 %vm227_vm2, %v566_v16 }
 0x7a4   :  { %3591 = vmatpush3.bf16.msra.mxu0 %v3588_v22  ;;  %v3096_v22 = vld [vmem:[%s4478_s14] ss:$0 sm:$0xff] }
 0x7a5   :  { %3593 = vmatprep.subr.bf16.mxu0 %v3592_v46 }
 0x7a8   :  { %3595 = vmatpush3.bf16.msra.mxu0 %v3592_v46 }
 0x7a9   :  { %3597 = vmatprep.subr.bf16.mxu0 %v3596_v49 }
 0x7ac   :  { %3599 = vmatpush3.bf16.msra.mxu0 %v3596_v49  ;;  %v3101_v49 = vld [vmem:[%s4513_s0 + $0x30] sm:$0xff] }
 0x7ad   :  { %3601 = vmatprep.subr.bf16.mxu0 %v3600_v41  ;;  %v3624_v52 = vpack.c.bf16 %v3102_v51, %v3101_v49 }
 0x7b0   :  { %3603 = vmatpush3.bf16.msra.mxu0 %v3600_v41 }
 0x7b1   :  { %3605 = vmatprep.subr.bf16.mxu0 %v3604_v55 }
 0x7b4   :  { %3607 = vmatpush3.bf16.msra.mxu0 %v3604_v55 }
 0x7b5   :  { %3609 = vmatprep.subr.bf16.mxu0 %v3608_v58 }
 0x7b8   :  { %3611 = vmatpush3.bf16.msra.mxu0 %v3608_v58 }
 0x876   :  { %v3365_v62 = vpop.f32.mrb[8].mxu0 }
 0x877   :  { %v1074_v63 = vadd.f32 %v3365_v62, %v3090_v61  ;;  %v1057_v0 = vpop.f32.mrb[9].mxu0  ;;  %v1245_v62 = vld [vmem:[%s4477_s13 + $0x70] sm:$0xff] }
 0x878   :  { %v1073_v1 = vadd.f32 %v3090_v61, %v1057_v0  ;;  %v3612_v61 = vpack.c.bf16 %v1244_v60, %v1243_v59  ;;  %v3097_v59 = vld [vmem:[%s4479_s15] ss:$0 sm:$0xff] }
 0x879   :  { %v1076_v2 = vadd.f32 %v1074_v63, %v3968_v35  ;;  %v1246_v63 = vld [vmem:[%s4477_s13 + $0x78] sm:$0xff] }
 0x87a   :  { %v1075_v3 = vadd.f32 %v1073_v1, %v3964_v33  ;;  %v1121_v33 = vld [vmem:[%s4475_s11] sm:$0xff]  ;;  %3613 = vmatprep.subr.bf16.mxu0 %v3612_v61  ;;  %v3616_v0 = vpack.c.bf16 %v1246_v63, %v1245_v62 }
 0x87b   :  { %v1082_v4 = vsel %vm84_vm0, %v1076_v2, 0.0  ;;  %v3580_v16 = vpack.c.bf16 %v1122_v15, %v1121_v33  ;;  %3615 = vmatpush3.bf16.msra.mxu0 %v3612_v61  ;;  %v3093_v1 = vld [vmem:[%s4476_s12] ss:$0 sm:$0xff] }
 0x87c   :  { %1083 = vadd.xlane.f32.xlu0 %v1082_v4  ;;  %v1079_v5 = vsel %vm84_vm0, %v1075_v3, 0.0  ;;  %3617 = vmatprep.subr.bf16.mxu0 %v3616_v0  ;;  %v3098_v63 = vld [vmem:[%s4480_s16] ss:$0 sm:$0xff] }
 0x87d   :  { %1080 = vadd.xlane.f32.xlu1 %v1079_v5  ;;  %3581 = vmatprep.subr.bf16.mxu1 %v3580_v16 }
 0x87e   :  { %3583 = vmatpush3.bf16.msra.mxu1 %v3580_v16 }
 0x87f   :  { %3585 = vmatprep.subr.bf16.mxu1 %v3584_v19  ;;  %3619 = vmatpush3.bf16.msra.mxu0 %v3616_v0 }
 0x880   :  { %3453 = vmatprep.subr.mxu0 %v3802_v36 }
 0x882   :  { %3587 = vmatpush3.bf16.msra.mxu1 %v3584_v19 }
 0x909   :  { %v1084_v6 = vpop.xlane.xlu0 %1083 }
 0x90a   :  { %v1086_v7 = vmul.f32 0.03125, %v1084_v6  ;;  %v1081_v8 = vpop.xlane.xlu1 %1080 }
 0x90b   :  { %v1085_v9 = vmul.f32 0.03125, %v1081_v8 }
 0x90c   :  { %v1088_v10 = vsub.f32 %v1076_v2, %v1086_v7 }
 0x90d   :  { %v1087_v11 = vsub.f32 %v1075_v3, %v1085_v9 }
 0x90e   :  { %v1090_v12 = vmul.f32 %v1088_v10, %v1088_v10 }
 0x90f   :  { %v1089_v13 = vmul.f32 %v1087_v11, %v1087_v11 }
 0x910   :  { %v1094_v14 = vsel %vm84_vm0, %v1090_v12, 0.0 }
 0x911   :  { %1095 = vadd.xlane.f32.xlu1 %v1094_v14  ;;  %v1091_v35 = vsel %vm84_vm0, %v1089_v13, 0.0 }
 0x912   :  { %1092 = vadd.xlane.f32.xlu0 %v1091_v35 }
 0x99e   :  { %v1096_v23 = vpop.xlane.xlu1 %1095 }
 0x99f   :  { %v1098_v24 = vmul.f32 0.03125, %v1096_v23  ;;  %v1093_v25 = vpop.xlane.xlu0 %1092 }
 0x9a0   :  { %v1097_v26 = vmul.f32 0.03125, %v1093_v25 }
 0x9a1   :  { %v1100_v27 = vadd.f32 1e-12, %v1098_v24 }
 0x9a2   :  { %v1099_v28 = vadd.f32 1e-12, %v1097_v26 }
 0x9a3   :  { %3730 = vrsqrt.f32 %v1100_v27 }
 0x9a4   :  { %3732 = vrsqrt.f32 %v1099_v28 }
 0x9ad   :  { %v3731_v29 = vpop.eup %3730 }
 0x9ae   :  { %v3733_v31 = vpop.eup %3732  ;;  %v1104_v32 = vmul.f32 %v3731_v29, %v1088_v10 }
 0x9af   :  { %v1103_v34 = vmul.f32 %v3733_v31, %v1087_v11 }
 0x9b0   :  { %v1112_v38 = vmul.f32 %v3091_v30, %v1104_v32 }
 0x9b1   :  { %v1111_v40 = vmul.f32 %v3091_v30, %v1103_v34 }
 0x9b2   :  { %v4113_v43 = vadd.f32 %v3092_v37, %v1112_v38 }
 0x9b3   :  { %v4111_v42 = vadd.f32 %v3092_v37, %v1111_v40 }
 0x9b5   :  { %3374 = vmatprep.mubr.msk.f32.mxu1 %vm84_vm0, %v4111_v42 }
 0x9b6   :  { %3375 = vmatmul.mubr.msk.f32.vlgmr.msra.gmra.mrb[10].mxu1 %vm84_vm0, %v4113_v43 }
 0xa89   :  { %v3376_v2 = vpop.f32.mrb[10].mxu1 }
 0xa8a   :  { %v1210_v3 = vadd.f32 %v3376_v2, %v3093_v1  ;;  %v1204_v4 = vpop.f32.mrb[11].mxu1 }
 0xa8b   :  { %v1205_v5 = vadd.f32 %v3093_v1, %v1204_v4  ;;  %v3104_v4 = vld [vmem:[%s4516_s7 + $0x1] ss:$0 sm:$0xff]  ;;  %s4520_s7 = smov 64  }
 0xa8c   :  { %v1216_v6 = vmul.f32 0.044715, %v1210_v3  ;;  %v1214_v19 = vmul.f32 0.5, %v1210_v3 }
 0xa8d   :  { %v1215_v7 = vmul.f32 0.044715, %v1205_v5  ;;  %v1213_v17 = vmul.f32 0.5, %v1205_v5 }
 0xa8e   :  { %v1218_v8 = vmul.f32 %v1216_v6, %v1210_v3 }
 0xa8f   :  { %v1217_v9 = vmul.f32 %v1215_v7, %v1205_v5 }
 0xa90   :  { %v1220_v10 = vmul.f32 %v1218_v8, %v1210_v3 }
 0xa91   :  { %v1219_v11 = vmul.f32 %v1217_v9, %v1205_v5 }
 0xa92   :  { %v1222_v12 = vadd.f32 %v1220_v10, %v1210_v3 }
 0xa93   :  { %v1221_v13 = vadd.f32 %v1219_v11, %v1205_v5 }
 0xa94   :  { %v1224_v14 = vmul.f32 0.7978846, %v1222_v12 }
 0xa95   :  { %v1223_v35 = vmul.f32 0.7978846, %v1221_v13 }
 0xa96   :  { %3734 = vtanh.f32 %v1224_v14 }
 0xa97   :  { %3736 = vtanh.f32 %v1223_v35 }
 0xaa0   :  { %v3735_v33 = vpop.eup %3734 }
 0xaa1   :  { %v3737_v15 = vpop.eup %3736  ;;  %v1228_v16 = vadd.f32 1.0, %v3735_v33 }
 0xaa2   :  { %v1227_v18 = vadd.f32 1.0, %v3737_v15 }
 0xaa3   :  { %v1230_v21 = vmul.f32 %v1228_v16, %v1214_v19 }
 0xaa4   :  { %v1229_v20 = vmul.f32 %v1227_v18, %v1213_v17 }
 0xaa6   :  { %3409 = vmatprep.mubr.f32.mxu0 %v1229_v20 }
 0xaa7   :  { %3410 = vmatmul.mubr.f32.vlgmr.msra.gmra.mrb[10].mxu0 %v1230_v21 }
 0xaa8   :  { %3455 = vmatprep.mubr.msk.f32.mxu0 %vm3803_vm1, %v3802_v36 }
 0xb7a   :  { %v3411_v23 = vpop.f32.mrb[10].mxu0 }
 0xb7b   :  { %v1326_v24 = vadd.f32 %v3411_v23, %v3096_v22  ;;  %v1320_v25 = vpop.f32.mrb[11].mxu0 }
 0xb7c   :  { %v1321_v26 = vadd.f32 %v3096_v22, %v1320_v25 }
 0xb7d   :  { %v1330_v27 = vadd.f32 %v1326_v24, %v4113_v43 }
 0xb7e   :  { %v1329_v28 = vadd.f32 %v1321_v26, %v4111_v42  ;;  %v3099_v42 = vld [vmem:[%s4513_s0 + $0x20] sm:$0xff] }
 0xb7f   :  { %v1336_v29 = vsel %vm84_vm0, %v1330_v27, 0.0  ;;  %v3620_v48 = vpack.c.bf16 %v3100_v47, %v3099_v42 }
 0xb80   :  { %1337 = vadd.xlane.f32.xlu1 %v1336_v29  ;;  %v1333_v30 = vsel %vm84_vm0, %v1329_v28, 0.0 }
 0xb81   :  { %1334 = vadd.xlane.f32.xlu0 %v1333_v30  ;;  %3621 = vmatprep.subr.bf16.mxu1 %v3620_v48 }
 0xb82   :  { %3623 = vmatpush3.bf16.msra.mxu1 %v3620_v48 }
 0xb83   :  { %3625 = vmatprep.subr.bf16.mxu1 %v3624_v52 }
 0xb86   :  { %3627 = vmatpush3.bf16.msra.mxu1 %v3624_v52 }
 0xb87   :  { %3423 = vmatprep.subr.mxu1 %v3802_v36 }
 0xc0d   :  { %v1338_v31 = vpop.xlane.xlu1 %1337 }
 0xc0e   :  { %v1340_v32 = vmul.f32 0.03125, %v1338_v31  ;;  %v1335_v34 = vpop.xlane.xlu0 %1334 }
 0xc0f   :  { %v1339_v37 = vmul.f32 0.03125, %v1335_v34 }
 0xc10   :  { %v1342_v38 = vsub.f32 %v1330_v27, %v1340_v32 }
 0xc11   :  { %v1341_v40 = vsub.f32 %v1329_v28, %v1339_v37 }
 0xc12   :  { %v1344_v39 = vmul.f32 %v1342_v38, %v1342_v38 }
 0xc13   :  { %v1343_v44 = vmul.f32 %v1341_v40, %v1341_v40 }
 0xc14   :  { %v1348_v46 = vsel %vm84_vm0, %v1344_v39, 0.0 }
 0xc15   :  { %1349 = vadd.xlane.f32.xlu1 %v1348_v46  ;;  %v1345_v43 = vsel %vm84_vm0, %v1343_v44, 0.0 }
 0xc16   :  { %1346 = vadd.xlane.f32.xlu0 %v1345_v43 }
 0xca2   :  { %v1350_v41 = vpop.xlane.xlu1 %1349 }
 0xca3   :  { %v1352_v53 = vmul.f32 0.03125, %v1350_v41  ;;  %v1347_v54 = vpop.xlane.xlu0 %1346 }
 0xca4   :  { %v1351_v55 = vmul.f32 0.03125, %v1347_v54 }
 0xca5   :  { %v1354_v56 = vadd.f32 1e-12, %v1352_v53 }
 0xca6   :  { %v1353_v57 = vadd.f32 1e-12, %v1351_v55 }
 0xca7   :  { %3738 = vrsqrt.f32 %v1354_v56 }
 0xca8   :  { %3740 = vrsqrt.f32 %v1353_v57 }
 0xcb1   :  { %v3739_v58 = vpop.eup %3738 }
 0xcb2   :  { %v3741_v60 = vpop.eup %3740  ;;  %v1358_v61 = vmul.f32 %v3739_v58, %v1342_v38 }
 0xcb3   :  { %v1357_v62 = vmul.f32 %v3741_v60, %v1341_v40 }
 0xcb4   :  { %v1366_v0 = vmul.f32 %v3097_v59, %v1358_v61 }
 0xcb5   :  { %v1365_v1 = vmul.f32 %v3097_v59, %v1357_v62 }
 0xcb6   :  { %v4197_v3 = vadd.f32 %v3098_v63, %v1366_v0 }
 0xcb7   :  { %v4195_v2 = vadd.f32 %v3098_v63, %v1365_v1 }
 0xcb9   :  { %3420 = vmatprep.mubr.msk.f32.mxu1 %vm84_vm0, %v4195_v2 }
 0xcba   :  { %3421 = vmatmul.mubr.msk.f32.vlgmr.msra.gmra.mrb[12].mxu1 %vm84_vm0, %v4197_v3 }
 0xcbb   :  { %3425 = vmatprep.mubr.msk.f32.mxu1 %vm3803_vm1, %v3802_v36 }
 0xd8d   :  { %v3422_v5 = vpop.f32.mrb[12].mxu1 }
 0xd8e   :  { %v4208_v6 = vadd.f32 %v3422_v5, %v3104_v4  ;;  %v1460_v7 = vpop.f32.mrb[13].mxu1 }
 0xd8f   :  { %v4210_v8 = vadd.f32 %v3104_v4, %v1460_v7 }
 0xd90   :  { %1552 = vrot.lane.b32.xlu1 %v4208_v6, %s3804_s30 }
 0xd91   :  { %1475 = vrot.lane.b32.xlu0 %v4210_v8, %s3804_s30  ;;  %s4521_s30 = smov 80  }
 0xe02   :  { %v1553_v10 = vpop.permute.xlu1 %1552 }
 0xe03   :  { %v1476_v9 = vpop.permute.xlu0 %1475 }
 0xe04   :  { %3424 = vmatpush3.xpose.msk.msra.mxu1 %vm227_vm2, %v1476_v9 }
 0xe05   :  { %3428 = vmatprep.subr.mxu1 %v3802_v36 }
 0xe07   :  { %3426 = vmatmul.mubr.msk.f32.vlgmr.msra.gmra.mrb[14].mxu1 %vm227_vm2, %v4210_v8 }
 0xe08   :  { %3429 = vmatpush3.xpose.msk.msra.mxu1 %vm227_vm2, %v1553_v10  ;;  %3430 = vmatprep.mubr.msk.f32.mxu1 %vm3803_vm1, %v3802_v36 }
 0xe09   :  { %3433 = vmatprep.subr.mxu1 %v3802_v36 }
 0xe0b   :  { %3431 = vmatmul.mubr.msk.f32.vlgmr.msra.gmra.mrb[16].mxu1 %vm227_vm2, %v4208_v6 }
 0xe0c   :  { %3435 = vmatprep.mubr.msk.f32.mxu1 %vm3803_vm1, %v3802_v36 }
 0xeda   :  { %v1547_v11 = vpop.f32.mrb[14].mxu1 }
 0xedb   :  { %v1628_v12 = vmul.f32 0.25, %v1547_v11  ;;  %v3427_v13 = vpop.f32.mrb[15].mxu1 }
 0xedd   :  { %v1630_v14 = vadd.f32 %v4004_v45, %v1628_v12 }
 0xede   :  { %v1624_v35 = vpop.f32.mrb[16].mxu1 }
 0xedf   :  { %v1629_v33 = vmul.f32 0.25, %v1624_v35  ;;  %v3432_v15 = vpop.f32.mrb[17].mxu1  ;;  %v1632_v16 = vsel %vm395_vm3, %v1630_v14, -inf  ;;  %v3109_v35 = vld [vmem:[%s4518_s29 + $0x30] sm:$0xff] }
 0xee0   :  { %1633 = vmax.xlane.f32.xlu1 %v1632_v16  ;;  %v3107_v15 = vld [vmem:[%s4518_s29 + $0x20] sm:$0xff]  ;;  %v3108_v16 = vld [vmem:[%s4518_s29 + $0x28] sm:$0xff] }
 0xee1   :  { %v1631_v17 = vadd.f32 %v4010_v50, %v1629_v33 }
 0xee3   :  { %v1635_v18 = vsel %vm395_vm3, %v1631_v17, -inf }
 0xee4   :  { %1636 = vmax.xlane.f32.xlu0 %v1635_v18 }
 0xef1   :  { %1730 = vrot.lane.b32.xlu1 %v4208_v6, %s4520_s7 }
 0xef5   :  { %1808 = vrot.lane.b32.xlu1 %v4210_v8, %s4521_s30 }
 0xef9   :  { %1806 = vrot.lane.b32.xlu1 %v4210_v8, %s4522_s1 }
 0xf6d   :  { %v1634_v19 = vpop.xlane.xlu1 %1633 }
 0xf6e   :  { %v1638_v20 = vsub.f32 %v1630_v14, %v1634_v19 }
 0xf70   :  { %v1640_v21 = vmul.f32 1.442695, %v1638_v20 }
 0xf71   :  { %v1637_v22 = vpop.xlane.xlu0 %1636  ;;  %v1731_v29 = vpop.permute.xlu1 %1730 }
 0xf72   :  { %3742 = vpow2.f32 %v1640_v21  ;;  %v1639_v23 = vsub.f32 %v1631_v17, %v1637_v22  ;;  %v3632_v17 = vpack.c.bf16 %v3108_v16, %v3107_v15  ;;  %v3128_v22 = vld [vmem:[%s4519_s28 + $0x1] ss:$0 sm:$0xff]  ;;  %v3152_v16 = vld [vmem:[%s4477_s13 + $0xd8] sm:$0xff] }
 0xf74   :  { %v1642_v24 = vmul.f32 1.442695, %v1639_v23 }
 0xf75   :  { %v1809_v30 = vpop.permute.xlu1 %1808 }
 0xf76   :  { %3744 = vpow2.f32 %v1642_v24 }
 0xf79   :  { %v1807_v31 = vpop.permute.xlu1 %1806 }
 0xf7c   :  { %v3743_v25 = vpop.eup %3742 }
 0xf7d   :  { %v1644_v26 = vsel %vm395_vm3, %v3743_v25, 0.0 }
 0xf7e   :  { %1645 = vadd.xlane.f32.xlu0 %v1644_v26 }
 0xf80   :  { %v3745_v27 = vpop.eup %3744 }
 0xf81   :  { %v1647_v28 = vsel %vm395_vm3, %v3745_v27, 0.0 }
 0xf82   :  { %1648 = vadd.xlane.f32.xlu1 %v1647_v28 }
 0xf93   :  { %1884 = vrot.lane.b32.xlu1 %v4208_v6, %s4522_s1 }
 0xf94   :  { %1654 = vrot.lane.b32.xlu0 %v4210_v8, %s4520_s7  ;;  %s3810_s7 = smov [#allocation2]  }
 0xf98   :  { %1886 = vrot.lane.b32.xlu0 %v4208_v6, %s4521_s30 }
0x100b   :  { %v1646_v32 = vpop.xlane.xlu0 %1645 }
0x100c   :  { %3746 = vrcp.f32 %v1646_v32 }
0x100f   :  { %v1649_v34 = vpop.xlane.xlu1 %1648  ;;  %v1655_v37 = vpop.permute.xlu0 %1654 }
0x1010   :  { %3748 = vrcp.f32 %v1649_v34  ;;  %3434 = vmatpush3.msra.mxu1 %v1655_v37 }
0x1011   :  { %3438 = vmatprep.subr.mxu1 %v3802_v36 }
0x1013   :  { %v1887_v46 = vpop.permute.xlu0 %1886  ;;  %v1885_v43 = vpop.permute.xlu1 %1884 }
0x1016   :  { %v3747_v38 = vpop.eup %3746 }
0x1017   :  { %v1652_v40 = vmul.f32 %v3747_v38, %v3743_v25 }
0x1019   :  { %3436 = vmatmul.mubr.msk.f32.vlgmr.msra.gmra.mrb[18].mxu1 %vm395_vm3, %v1652_v40 }
0x101a   :  { %v3749_v39 = vpop.eup %3748  ;;  %3439 = vmatpush3.msra.mxu1 %v1731_v29  ;;  %3440 = vmatprep.mubr.msk.f32.mxu1 %vm3803_vm1, %v3802_v36 }
0x101b   :  { %v1653_v44 = vmul.f32 %v3749_v39, %v3745_v27  ;;  %3443 = vmatprep.subr.mxu1 %v3802_v36 }
0x101d   :  { %3441 = vmatmul.mubr.msk.f32.vlgmr.msra.gmra.mrb[20].mxu1 %vm395_vm3, %v1653_v44 }
0x101e   :  { %3445 = vmatprep.mubr.msk.f32.mxu1 %vm3803_vm1, %v3802_v36 }
0x1021   :  { %3444 = vmatpush3.xpose.msk.msra.mxu1 %vm227_vm2, %v1809_v30 }
0x1022   :  { %3448 = vmatprep.subr.mxu1 %v3802_v36 }
0x1024   :  { %3446 = vmatmul.mubr.msk.f32.vlgmr.msra.gmra.mrb[22].mxu1 %vm227_vm2, %v1807_v31 }
0x1025   :  { %3449 = vmatpush3.xpose.msk.msra.mxu1 %vm227_vm2, %v1887_v46  ;;  %3450 = vmatprep.mubr.msk.f32.mxu1 %vm3803_vm1, %v3802_v36 }
0x1026   :  { %3458 = vmatprep.subr.mxu1 %v3802_v36 }
0x1028   :  { %3451 = vmatmul.mubr.msk.f32.vlgmr.msra.gmra.mrb[24].mxu1 %vm227_vm2, %v1885_v43  ;;  %v3134_v43 = vld [vmem:[%s4475_s11 + $0x28] sm:$0xff] }
0x1029   :  { %3460 = vmatprep.mubr.msk.f32.mxu1 %vm3803_vm1, %v3802_v36 }
0x10ec   :  { %v1726_v42 = vpop.f32.mrb[18].mxu1 }
0x10ed   :  { %v3437_v47 = vpop.f32.mrb[19].mxu1 }
0x10ee   :  { %v3135_v47 = vld [vmem:[%s4475_s11 + $0x30] sm:$0xff] }
0x10f0   :  { %v1802_v48 = vpop.f32.mrb[20].mxu1 }
0x10f1   :  { %v3442_v49 = vpop.f32.mrb[21].mxu1 }
0x10f7   :  { %v1880_v51 = vpop.f32.mrb[22].mxu1 }
0x10f8   :  { %v1962_v52 = vmul.f32 0.25, %v1880_v51  ;;  %v3447_v41 = vpop.f32.mrb[23].mxu1  ;;  %v3141_v51 = vld [vmem:[%s4477_s13 + $0x80] sm:$0xff] }
0x10fa   :  { %v1964_v53 = vadd.f32 %v4004_v45, %v1962_v52  ;;  %v3142_v52 = vld [vmem:[%s4477_s13 + $0x88] sm:$0xff] }
0x10fb   :  { %v1958_v54 = vpop.f32.mrb[24].mxu1  ;;  %v3644_v41 = vpack.c.bf16 %v3142_v52, %v3141_v51  ;;  %v3158_v51 = vld [vmem:[%s4478_s14 + $0x1] ss:$0 sm:$0xff] }
0x10fc   :  { %v1963_v55 = vmul.f32 0.25, %v1958_v54  ;;  %v3452_v56 = vpop.f32.mrb[25].mxu1  ;;  %v1966_v57 = vsel %vm395_vm3, %v1964_v53, -inf }
0x10fd   :  { %1967 = vmax.xlane.f32.xlu0 %v1966_v57 }
0x10fe   :  { %v1965_v58 = vadd.f32 %v4010_v50, %v1963_v55 }
0x1100   :  { %v1969_v59 = vsel %vm395_vm3, %v1965_v58, -inf }
0x1101   :  { %1970 = vmax.xlane.f32.xlu1 %v1969_v59 }
0x1112   :  { %2064 = vrot.lane.b32.xlu1 %v4208_v6, %s4523_s6 }
0x118a   :  { %v1968_v60 = vpop.xlane.xlu0 %1967 }
0x118b   :  { %v1972_v61 = vsub.f32 %v1964_v53, %v1968_v60  ;;  %v3131_v60 = vld [vmem:[%s4473_s9 + $0x1] ss:$0 sm:$0xff]  ;;  %s3059_s9 = sshll.u32 %s3810_s7, 4  ;;  %s3060_s9 = int_to_ptr.vmem [resolvable:$true] %s3059_s9 }
0x118c   :  { %p3783_p1 = scmp.lt.s32.totalorder %s3060_s9, %s3060_s9 }
0x118d   :  { %v1974_v62 = vmul.f32 1.442695, %v1972_v61 }
0x118e   :  { %v1971_v63 = vpop.xlane.xlu1 %1970 }
0x118f   :  { %3750 = vpow2.f32 %v1974_v62  ;;  %v1973_v45 = vsub.f32 %v1965_v58, %v1971_v63 }
0x1191   :  { %v1976_v0 = vmul.f32 1.442695, %v1973_v45  ;;  %v3132_v45 = vld [vmem:[%s4474_s10 + $0x1] ss:$0 sm:$0xff] }
0x1192   :  { %v2065_v1 = vpop.permute.xlu1 %2064 }
0x1193   :  { %3752 = vpow2.f32 %v1976_v0  ;;  %3459 = vmatpush3.msra.mxu1 %v2065_v1 }
0x1199   :  { %v3751_v4 = vpop.eup %3750 }
0x119a   :  { %v1978_v5 = vsel %vm395_vm3, %v3751_v4, 0.0 }
0x119b   :  { %1979 = vadd.xlane.f32.xlu0 %v1978_v5 }
0x119d   :  { %v3753_v50 = vpop.eup %3752 }
0x119e   :  { %v1981_v7 = vsel %vm395_vm3, %v3753_v50, 0.0 }
0x119f   :  { %1982 = vadd.xlane.f32.xlu0 %v1981_v7  ;;  %v3144_v7 = vld [vmem:[%s4477_s13 + $0x98] sm:$0xff] }
0x11b5   :  { %1988 = vrot.lane.b32.xlu0 %v4210_v8, %s4523_s6  ;;  %v3110_v8 = vld [vmem:[%s4518_s29 + $0x38] sm:$0xff] }
0x11b6   :  { %v3628_v33 = vpack.c.bf16 %v3110_v8, %v3109_v35  ;;  %v3149_v35 = vld [vmem:[%s4477_s13 + $0xc0] sm:$0xff]  ;;  %v3150_v8 = vld [vmem:[%s4477_s13 + $0xc8] sm:$0xff] }
0x11b7   :  { %v3660_v15 = vpack.c.bf16 %v3150_v8, %v3149_v35 }
0x1228   :  { %v1980_v6 = vpop.xlane.xlu0 %1979 }
0x1229   :  { %3754 = vrcp.f32 %v1980_v6 }
0x122c   :  { %v1983_v9 = vpop.xlane.xlu0 %1982 }
0x122d   :  { %3756 = vrcp.f32 %v1983_v9  ;;  %v3145_v9 = vld [vmem:[%s4477_s13 + $0xa0] sm:$0xff] }
0x1230   :  { %v1989_v10 = vpop.permute.xlu0 %1988 }
0x1231   :  { %3454 = vmatpush3.msra.mxu0 %v1989_v10  ;;  %v3146_v10 = vld [vmem:[%s4477_s13 + $0xa8] sm:$0xff] }
0x1232   :  { %3629 = vmatprep.subr.bf16.mxu0 %v3628_v33 }
0x1233   :  { %v3755_v11 = vpop.eup %3754 }
0x1234   :  { %v1986_v12 = vmul.f32 %v3755_v11, %v3751_v4  ;;  %v3652_v11 = vpack.c.bf16 %v3146_v10, %v3145_v9  ;;  %v2622_v9 = vld [vmem:[%s4481_s17 + $0x10] sm:$0xff]  ;;  %v2623_v10 = vld [vmem:[%s4481_s17 + $0x18] sm:$0xff] }
0x1236   :  { %3456 = vmatmul.mubr.msk.f32.vlgmr.msra.gmra.mrb[12].mxu0 %vm395_vm3, %v1986_v12  ;;  %v3147_v12 = vld [vmem:[%s4477_s13 + $0xb0] sm:$0xff] }
0x1237   :  { %v3757_v13 = vpop.eup %3756  ;;  %3631 = vmatpush3.bf16.msra.mxu0 %v3628_v33  ;;  %v3151_v33 = vld [vmem:[%s4477_s13 + $0xd0] sm:$0xff] }
0x1238   :  { %v1987_v14 = vmul.f32 %v3757_v13, %v3753_v50  ;;  %3633 = vmatprep.subr.bf16.mxu0 %v3632_v17  ;;  %v3143_v50 = vld [vmem:[%s4477_s13 + $0x90] sm:$0xff]  ;;  %v3148_v13 = vld [vmem:[%s4477_s13 + $0xb8] sm:$0xff] }
0x1239   :  { %v3648_v6 = vpack.c.bf16 %v3144_v7, %v3143_v50  ;;  %v2621_v7 = vld [vmem:[%s4481_s17 + $0x8] sm:$0xff] }
0x123a   :  { %3461 = vmatmul.mubr.msk.f32.vlgmr.msra.gmra.mrb[26].mxu1 %vm395_vm3, %v1987_v14  ;;  %v3656_v14 = vpack.c.bf16 %v3148_v13, %v3147_v12 }
0x1309   :  { %v2060_v18 = vpop.f32.mrb[12].mxu0 }
0x130a   :  { %v3457_v19 = vpop.f32.mrb[13].mxu0  ;;  %3467 = vmatprep.mubr.msk.f32.mxu0 %vm227_vm2, %v2060_v18  ;;  %v3153_v18 = vld [vmem:[%s4477_s13 + $0xe0] sm:$0xff] }
0x130b   :  { %v3154_v19 = vld [vmem:[%s4477_s13 + $0xe8] sm:$0xff] }
0x130d   :  { %v2136_v20 = vpop.f32.mrb[26].mxu1 }
0x130e   :  { %v3462_v21 = vpop.f32.mrb[27].mxu1  ;;  %3468 = vmatmul.mubr.msk.f32.vlgmr.msra.gmra.mrb[14].mxu0 %vm227_vm2, %v2136_v20  ;;  %v3668_v20 = vpack.c.bf16 %v3154_v19, %v3153_v18  ;;  %v3162_v19 = vld [vmem:[%s4480_s16 + $0x1] ss:$0 sm:$0xff] }
0x130f   :  { %3635 = vmatpush3.bf16.msra.mxu0 %v3632_v17  ;;  %3474 = vmatprep.mubr.msk.f32.mxu0 %vm227_vm2, %v1726_v42  ;;  %v3664_v17 = vpack.c.bf16 %v3152_v16, %v3151_v33  ;;  %v3155_v21 = vld [vmem:[%s4477_s13 + $0xf0] sm:$0xff]  ;;  %v3161_v16 = vld [vmem:[%s4479_s15 + $0x1] ss:$0 sm:$0xff] }
0x1310   :  { %3645 = vmatprep.subr.bf16.mxu0 %v3644_v41 }
0x1316   :  { %3475 = vmatmul.mubr.msk.f32.vlgmr.msra.gmra.mrb[14].mxu0 %vm227_vm2, %v1802_v48  ;;  %v3136_v48 = vld [vmem:[%s4475_s11 + $0x38] sm:$0xff] }
0x1317   :  { %v3640_v49 = vpack.c.bf16 %v3136_v48, %v3135_v47  ;;  %3647 = vmatpush3.bf16.msra.mxu0 %v3644_v41 }
0x1318   :  { %3649 = vmatprep.subr.bf16.mxu0 %v3648_v6 }
0x131b   :  { %3651 = vmatpush3.bf16.msra.mxu0 %v3648_v6 }
0x131c   :  { %3653 = vmatprep.subr.bf16.mxu0 %v3652_v11 }
0x131f   :  { %3655 = vmatpush3.bf16.msra.mxu0 %v3652_v11  ;;  %v3680_v11 = vpack.c.bf16 %v2623_v10, %v2622_v9 }
0x1320   :  { %3657 = vmatprep.subr.bf16.mxu0 %v3656_v14 }
0x1323   :  { %3659 = vmatpush3.bf16.msra.mxu0 %v3656_v14 }
0x1324   :  { %3661 = vmatprep.subr.bf16.mxu0 %v3660_v15 }
0x1327   :  { %3663 = vmatpush3.bf16.msra.mxu0 %v3660_v15 }
0x1328   :  { %3665 = vmatprep.subr.bf16.mxu0 %v3664_v17 }
0x132b   :  { %3667 = vmatpush3.bf16.msra.mxu0 %v3664_v17 }
0x132c   :  { %3669 = vmatprep.subr.bf16.mxu0 %v3668_v20 }
0x132f   :  { %3671 = vmatpush3.bf16.msra.mxu0 %v3668_v20 }
0x13e9   :  { %v3476_v23 = vpop.f32.mrb[14].mxu0 }
0x13ea   :  { %v2311_v24 = vadd.f32 %v3476_v23, %v3128_v22  ;;  %v2293_v25 = vpop.f32.mrb[15].mxu0 }
0x13eb   :  { %v2310_v26 = vadd.f32 %v3128_v22, %v2293_v25  ;;  %v3156_v22 = vld [vmem:[%s4477_s13 + $0xf8] sm:$0xff] }
0x13ec   :  { %v2313_v27 = vadd.f32 %v2311_v24, %v4197_v3  ;;  %v3672_v23 = vpack.c.bf16 %v3156_v22, %v3155_v21  ;;  %v3138_v24 = vld [vmem:[%s4476_s12 + $0x1] ss:$0 sm:$0xff] }
0x13ed   :  { %v2312_v28 = vadd.f32 %v2310_v26, %v4195_v2  ;;  %v3133_v2 = vld [vmem:[%s4475_s11 + $0x20] sm:$0xff] }
0x13ee   :  { %v2321_v29 = vsel %vm84_vm0, %v2313_v27, 0.0  ;;  %v3636_v42 = vpack.c.bf16 %v3134_v43, %v3133_v2  ;;  %3673 = vmatprep.subr.bf16.mxu0 %v3672_v23 }
0x13ef   :  { %2322 = vadd.xlane.f32.xlu0 %v2321_v29  ;;  %v2318_v30 = vsel %vm84_vm0, %v2312_v28, 0.0  ;;  %3675 = vmatpush3.bf16.msra.mxu0 %v3672_v23 }
0x13f0   :  { %2319 = vadd.xlane.f32.xlu1 %v2318_v30  ;;  %3637 = vmatprep.subr.bf16.mxu1 %v3636_v42 }
0x13f1   :  { %3639 = vmatpush3.bf16.msra.mxu1 %v3636_v42 }
0x13f2   :  { %3641 = vmatprep.subr.bf16.mxu1 %v3640_v49 }
0x13f5   :  { %3643 = vmatpush3.bf16.msra.mxu1 %v3640_v49 }
0x147c   :  { %v2323_v31 = vpop.xlane.xlu0 %2322 }
0x147d   :  { %v2325_v32 = vmul.f32 0.03125, %v2323_v31  ;;  %v2320_v34 = vpop.xlane.xlu1 %2319 }
0x147e   :  { %v2324_v37 = vmul.f32 0.03125, %v2320_v34 }
0x147f   :  { %v2327_v38 = vsub.f32 %v2313_v27, %v2325_v32 }
0x1480   :  { %v2326_v40 = vsub.f32 %v2312_v28, %v2324_v37 }
0x1481   :  { %v2329_v39 = vmul.f32 %v2327_v38, %v2327_v38 }
0x1482   :  { %v2328_v44 = vmul.f32 %v2326_v40, %v2326_v40 }
0x1483   :  { %v2333_v46 = vsel %vm84_vm0, %v2329_v39, 0.0 }
0x1484   :  { %2334 = vadd.xlane.f32.xlu1 %v2333_v46  ;;  %v2330_v3 = vsel %vm84_vm0, %v2328_v44, 0.0 }
0x1485   :  { %2331 = vadd.xlane.f32.xlu0 %v2330_v3 }
0x1511   :  { %v2335_v53 = vpop.xlane.xlu1 %2334 }
0x1512   :  { %v2337_v54 = vmul.f32 0.03125, %v2335_v53  ;;  %v2332_v55 = vpop.xlane.xlu0 %2331 }
0x1513   :  { %v2336_v56 = vmul.f32 0.03125, %v2332_v55 }
0x1514   :  { %v2339_v57 = vadd.f32 1e-12, %v2337_v54 }
0x1515   :  { %v2338_v58 = vadd.f32 1e-12, %v2336_v56 }
0x1516   :  { %3758 = vrsqrt.f32 %v2339_v57 }
0x1517   :  { %3760 = vrsqrt.f32 %v2338_v58 }
0x1520   :  { %v3759_v59 = vpop.eup %3758 }
0x1521   :  { %v3761_v61 = vpop.eup %3760  ;;  %v2343_v62 = vmul.f32 %v3759_v59, %v2327_v38 }
0x1522   :  { %v2342_v63 = vmul.f32 %v3761_v61, %v2326_v40 }
0x1523   :  { %v2351_v0 = vmul.f32 %v3131_v60, %v2343_v62 }
0x1524   :  { %v2350_v1 = vmul.f32 %v3131_v60, %v2342_v63 }
0x1525   :  { %v4327_v5 = vadd.f32 %v3132_v45, %v2351_v0 }
0x1526   :  { %v4325_v4 = vadd.f32 %v3132_v45, %v2350_v1 }
0x1528   :  { %3485 = vmatprep.mubr.msk.f32.mxu1 %vm84_vm0, %v4325_v4 }
0x1529   :  { %3486 = vmatmul.mubr.msk.f32.vlgmr.msra.gmra.mrb[28].mxu1 %vm84_vm0, %v4327_v5 }
0x15fc   :  { %v3487_v25 = vpop.f32.mrb[28].mxu1 }
0x15fd   :  { %v2451_v26 = vadd.f32 %v3487_v25, %v3138_v24  ;;  %v2445_v27 = vpop.f32.mrb[29].mxu1 }
0x15fe   :  { %v2446_v28 = vadd.f32 %v3138_v24, %v2445_v27  ;;  %v3163_v27 = vld [vmem:[%s4482_s18] ss:$0 sm:$0xff] }
0x15ff   :  { %v2457_v29 = vmul.f32 0.044715, %v2451_v26  ;;  %v2455_v47 = vmul.f32 0.5, %v2451_v26 }
0x1600   :  { %v2456_v30 = vmul.f32 0.044715, %v2446_v28  ;;  %v2454_v43 = vmul.f32 0.5, %v2446_v28 }
0x1601   :  { %v2459_v31 = vmul.f32 %v2457_v29, %v2451_v26 }
0x1602   :  { %v2458_v32 = vmul.f32 %v2456_v30, %v2446_v28 }
0x1603   :  { %v2461_v34 = vmul.f32 %v2459_v31, %v2451_v26 }
0x1604   :  { %v2460_v37 = vmul.f32 %v2458_v32, %v2446_v28 }
0x1605   :  { %v2463_v38 = vadd.f32 %v2461_v34, %v2451_v26  ;;  %v3809_v26 = vmov 0.0|0.0  }
0x1606   :  { %v2462_v40 = vadd.f32 %v2460_v37, %v2446_v28 }
0x1607   :  { %v2465_v39 = vmul.f32 0.7978846, %v2463_v38  ;;  %v2714_v38 = vld [vmem:[%s4483_s19] sm:$0x1] }
0x1608   :  { %v2464_v44 = vmul.f32 0.7978846, %v2462_v40  ;;  %v2796_v40 = vlaneseq }
0x1609   :  { %3762 = vtanh.f32 %v2465_v39 }
0x160a   :  { %3764 = vtanh.f32 %v2464_v44  ;;  %v2797_v39 = vshrl.u32 %v2796_v40, 7 }
0x160c   :  { %v2798_v44 = vsub.s32 0, %v2797_v39 }
0x1613   :  { %v3763_v46 = vpop.eup %3762 }
0x1614   :  { %v3765_v3 = vpop.eup %3764  ;;  %v2469_v2 = vadd.f32 1.0, %v3763_v46  ;;  %v2794_v46 = vld [vmem:[%s4524_s2] sm:$0x3] }
0x1615   :  { %v2468_v42 = vadd.f32 1.0, %v3765_v3  ;;  %vm2795_vm5 = vcmp.gt.f32.partialorder %v2794_v46, 0.5 }
0x1616   :  { %v2471_v49 = vmul.f32 %v2469_v2, %v2455_v47 }
0x1617   :  { %v2470_v48 = vmul.f32 %v2468_v42, %v2454_v43 }
0x1619   :  { %3520 = vmatprep.mubr.f32.mxu0 %v2470_v48 }
0x161a   :  { %3521 = vmatmul.mubr.f32.vlgmr.msra.gmra.mrb[16].mxu0 %v2471_v49 }
0x16ed   :  { %v3522_v52 = vpop.f32.mrb[16].mxu0 }
0x16ee   :  { %v2569_v41 = vadd.f32 %v3522_v52, %v3158_v51  ;;  %v2563_v53 = vpop.f32.mrb[17].mxu0 }
0x16ef   :  { %v2564_v54 = vadd.f32 %v3158_v51, %v2563_v53 }
0x16f0   :  { %v2573_v55 = vadd.f32 %v2569_v41, %v4327_v5 }
0x16f1   :  { %v2572_v56 = vadd.f32 %v2564_v54, %v4325_v4  ;;  %v2620_v4 = vld [vmem:[%s4481_s17] sm:$0xff] }
0x16f2   :  { %v2581_v57 = vsel %vm84_vm0, %v2573_v55, 0.0  ;;  %v3676_v6 = vpack.c.bf16 %v2621_v7, %v2620_v4  ;;  %v2886_v54 = vld [vmem:[%s4484_s20] sm:$0xff] }
0x16f3   :  { %2582 = vadd.xlane.f32.xlu1 %v2581_v57  ;;  %v2578_v58 = vsel %vm84_vm0, %v2572_v56, 0.0  ;;  %v3172_v7 = vld [vmem:[%s4487_s23] ss:$0 sm:$0xff] }
0x16f4   :  { %2579 = vadd.xlane.f32.xlu0 %v2578_v58  ;;  %3677 = vmatprep.subr.bf16.mxu1 %v3676_v6 }
0x16f5   :  { %3679 = vmatpush3.bf16.msra.mxu1 %v3676_v6 }
0x16f6   :  { %3681 = vmatprep.subr.bf16.mxu1 %v3680_v11 }
0x16f9   :  { %3683 = vmatpush3.bf16.msra.mxu1 %v3680_v11 }
0x16fa   :  { %3684 = vmatprep.subr.bf16.mxu1 %v3809_v26 }
0x1780   :  { %v2583_v59 = vpop.xlane.xlu1 %2582 }
0x1781   :  { %v2585_v60 = vmul.f32 0.03125, %v2583_v59  ;;  %v2580_v61 = vpop.xlane.xlu0 %2579  ;;  %v2888_v59 = vld [vmem:[%s4484_s20 + $0x10] sm:$0xff] }
0x1782   :  { %v2584_v62 = vmul.f32 0.03125, %v2580_v61 }
0x1783   :  { %v2587_v63 = vsub.f32 %v2573_v55, %v2585_v60  ;;  %v2887_v55 = vld [vmem:[%s4484_s20 + $0x8] sm:$0xff]  ;;  %v2889_v60 = vld [vmem:[%s4484_s20 + $0x18] sm:$0xff] }
0x1784   :  { %v2586_v45 = vsub.f32 %v2572_v56, %v2584_v62  ;;  %v3692_v57 = vpack.c.bf16 %v2887_v55, %v2886_v54  ;;  %v3695_v61 = vpack.c.bf16 %v2889_v60, %v2888_v59 }
0x1785   :  { %v2589_v0 = vmul.f32 %v2587_v63, %v2587_v63 }
0x1786   :  { %v2588_v1 = vmul.f32 %v2586_v45, %v2586_v45 }
0x1787   :  { %v2593_v50 = vsel %vm84_vm0, %v2589_v0, 0.0  ;;  %v3170_v0 = vld [vmem:[%s4485_s21] ss:$0 sm:$0xff] }
0x1788   :  { %2594 = vadd.xlane.f32.xlu1 %v2593_v50  ;;  %v2590_v5 = vsel %vm84_vm0, %v2588_v1, 0.0 }
0x1789   :  { %2591 = vadd.xlane.f32.xlu0 %v2590_v5 }
0x1815   :  { %v2595_v12 = vpop.xlane.xlu1 %2594 }
0x1816   :  { %v2597_v13 = vmul.f32 0.03125, %v2595_v12  ;;  %v2592_v14 = vpop.xlane.xlu0 %2591 }
0x1817   :  { %v2596_v35 = vmul.f32 0.03125, %v2592_v14 }
0x1818   :  { %v2599_v8 = vadd.f32 1e-12, %v2597_v13 }
0x1819   :  { %v2598_v33 = vadd.f32 1e-12, %v2596_v35 }
0x181a   :  { %3766 = vrsqrt.f32 %v2599_v8 }
0x181b   :  { %3768 = vrsqrt.f32 %v2598_v33 }
0x1824   :  { %v3767_v15 = vpop.eup %3766 }
0x1825   :  { %v3769_v17 = vpop.eup %3768  ;;  %v2603_v18 = vmul.f32 %v3767_v15, %v2587_v63 }
0x1826   :  { %v2602_v20 = vmul.f32 %v3769_v17, %v2586_v45  ;;  %v2971_v45 = vld [vmem:[%s4486_s22] sm:$0xff]  ;;  %s3778_s22 = scalar_lea.vmem %s3060_s9, 32 }
0x1827   :  { %v2611_v21 = vmul.f32 %v3161_v16, %v2603_v18  ;;  %p3779_p0 = scmp.ne.s32.totalorder %s3060_s9, %s3778_s22  ;;  %p3784_p2 = scmp.lt.s32.totalorder %s3778_s22, %s3778_s22 }
0x1828   :  { %v2610_v22 = vmul.f32 %v3161_v16, %v2602_v20 }
0x1829   :  { %v2619_v23 = vadd.f32 %v3162_v19, %v2611_v21  ;;  %p3785_p3 = por %p3784_p2, %p3783_p1 }
0x182a   :  { %v2618_v24 = vadd.f32 %v3162_v19, %v2610_v22 }
0x182b   :  { %p3786_p4 = pnand %p3785_p3, %p3779_p0 }
0x182c   :  { %3531 = vmatprep.mubr.msk.f32.mxu1 %vm84_vm0, %v2618_v24  ;;  %v3689_v25 = vpack.c.bf16 %v2619_v23, %v2618_v24 }
0x182d   :  { %3532 = vmatmul.mubr.msk.f32.vlgmr.msra.gmra.mrb[30].mxu1 %vm84_vm0, %v2619_v23 }
0x182e   :  { %3538 = vmatprep.mubr.msk.f32.mxu1 %vm3803_vm1, %v3802_v36 }
0x1900   :  { %v3533_v28 = vpop.f32.mrb[30].mxu1 }
0x1901   :  { %v2709_v29 = vadd.f32 %v3533_v28, %v3163_v27  ;;  %v2703_v30 = vpop.f32.mrb[31].mxu1 }
0x1902   :  { %v2704_v31 = vadd.f32 %v3163_v27, %v2703_v30 }
0x1903   :  { %3770 = vtanh.f32 %v2709_v29 }
0x1904   :  { %3772 = vtanh.f32 %v2704_v31 }
0x190d   :  { %v3771_v32 = vpop.eup %3770 }
0x190e   :  { %v3773_v34 = vpop.eup %3772 }
0x190f   :  { %v3685_v37 = vpack.c.bf16 %v3771_v32, %v3773_v34 }
0x1911   :  { %3687 = vmatpush3.bf16.xpose.msk.msra.mxu1 %vm3686_vm4, %v3685_v37 }
0x1912   :  { %3688 = vmatprep.subr.bf16.mxu1 %v3809_v26 }
0x1918   :  { %3539 = vmatmul.mubr.msk.f32.vlgmr.msra.gmra.mrb[32].mxu1 %vm84_vm0, %v2714_v38 }
0x1919   :  { %3690 = vmatpush3.bf16.msra.mxu1 %v3689_v25  ;;  %3545 = vmatprep.mubr.msk.f32.mxu1 %vm3803_vm1, %v3802_v36 }
0x191a   :  { %3691 = vmatprep.subr.bf16.mxu1 %v3809_v26 }
0x19eb   :  { %v2790_v3 = vpop.f32.mrb[32].mxu1 }
0x19ec   :  { %v2799_v2 = vrot.slane %v2790_v3, %v2798_v44  ;;  %v3540_v43 = vpop.f32.mrb[33].mxu1 }
0x19ee   :  { %v2800_v42 = vsel %vm2795_vm5, %v2799_v2, -1e+09 }
0x19ef   :  { %v2802_v47 = vsel %vm2801_vm6, %v2800_v42, -inf }
0x19f0   :  { %2803 = vmax.xlane.f32.xlu0 %v2802_v47 }
0x1a7d   :  { %v2804_v48 = vpop.xlane.xlu0 %2803 }
0x1a7e   :  { %v2805_v49 = vsub.f32 %v2800_v42, %v2804_v48 }
0x1a80   :  { %v2806_v51 = vmul.f32 1.442695, %v2805_v49 }
0x1a82   :  { %3774 = vpow2.f32 %v2806_v51 }
0x1a8c   :  { %v3775_v52 = vpop.eup %3774 }
0x1a8d   :  { %v2808_v41 = vsel %vm2801_vm6, %v3775_v52, 0.0 }
0x1a8e   :  { %2809 = vadd.xlane.f32.xlu1 %v2808_v41 }
0x1b1b   :  { %v2810_v53 = vpop.xlane.xlu1 %2809 }
0x1b1c   :  { %3776 = vrcp.f32 %v2810_v53 }
0x1b26   :  { %v3777_v56 = vpop.eup %3776 }
0x1b27   :  { %v2812_v58 = vmul.f32 %v3777_v56, %v3775_v52 }
0x1b29   :  { %3546 = vmatmul.mubr.msk.f32.vlgmr.msra.gmra.mrb[34].mxu1 %vm227_vm2, %v2812_v58 }
0x1b2a   :  { %3693 = vmatpush3.bf16.msra.mxu1 %v3692_v57  ;;  %3556 = vmatprep.mubr.msk.f32.mxu1 %vm3803_vm1, %v3802_v36 }
0x1b2b   :  { %3694 = vmatprep.subr.bf16.mxu1 %v3809_v26 }
0x1b2e   :  { %3696 = vmatpush3.bf16.msra.mxu1 %v3695_v61 }
0x1b2f   :  { %3559 = vmatprep.subr.mxu1 %v3802_v36 }
0x1bfc   :  { %v2882_v62 = vpop.f32.mrb[34].mxu1 }
0x1bfd   :  { %v3547_v63 = vpop.f32.mrb[35].mxu1  ;;  %3557 = vmatmul.mubr.msk.f32.vlgmr.msra.gmra.mrb[36].mxu1 %vm84_vm0, %v2882_v62 }
0x1bfe   :  { %3561 = vmatprep.mubr.msk.f32.mxu1 %vm3803_vm1, %v3802_v36  ;;  %3560 = vmatpush3.msra.mxu1 %v2971_v45 }
0x1cd0   :  { %v2966_v1 = vpop.f32.mrb[36].mxu1 }
0x1cd1   :  { %v2967_v50 = vadd.f32 %v3170_v0, %v2966_v1  ;;  %v3558_v5 = vpop.f32.mrb[37].mxu1 }
0x1cd3   :  { %v2970_v4 = vmax.f32 %v2967_v50, 0.0 }
0x1cd5   :  { %3562 = vmatmul.mubr.msk.f32.vlgmr.msra.gmra.mrb[38].mxu1 %vm395_vm3, %v2970_v4 }
0x1da8   :  { %v3048_v36 = vpop.f32.mrb[38].mxu1 }
0x1da9   :  { %v3049_v6 = vadd.f32 %v3172_v7, %v3048_v36  ;;  %v3563_v9 = vpop.f32.mrb[39].mxu1 }
0x1dab   :  { %3052 = vst [vmem:[#allocation2] sm:$0x3] %v3049_v6 }
0x1dac   :  { %3789 = shalt.err (!%p3786_p4)
}
0x1dad   :  { %s3790_s28 = scalar_lea.hbm %s4488_s24, 32 }
0x1dae   :  { %p3791_p5 = scmp.ne.s32.totalorder %s4488_s24, %s3790_s28  ;;  %p3794_p6 = scmp.lt.u32.totalorder %s3790_s28, %s4488_s24 }
0x1db0   :  { %p3796_p7 = pnand %p3794_p6, %p3791_p5 }
0x1db2   :  { %3799 = shalt.err (!%p3796_p7)
}
0x1db3   :  { %3062 = dma.vmem_to_hbm [thread:$0]  %s3060_s9, 32, %s4488_s24, [#allocation3]  }
0x1db4   :  { %3800 = dma.done.wait [#allocation3], 32  }
0x1db5   :  { %3801 = vsyncadd [#allocation3], 4294967264 }
0x1db6   :  { %3066 = vsyncpa [#allocation3], 1 }

</bundles_post_ra>
